<compile_context>
chip_gen: v7x
topology: tpu7x:2x2x1
jax: 0.10.0
libtpu: 0.0.40
codegen_flags: <defaults>
</compile_context>

<pallas_src>
import jax
import jax.numpy as jnp
from jax.experimental import pallas as pl
from jax.experimental.pallas import tpu as pltpu

# ---------------- small synthetic config ----------------
B = 2
S = 8
NUM_FEATURES = 8
CNN_CHANNELS = (8, 16, 32)
KSIZE = 3
LSTM_HIDDEN = 32
NUM_CLASSES = 4
IDX_DISTANCE = -3
IDX_AIRTIME = -5
E_LAMBDA = 1e-4
EPS_Q = 1e-6
BN_EPS = 1e-5


# ---------------- single fused forward kernel ----------------
def fused_forward_kernel(
        qk_ref,                                   # SMEM (2,): [k_s, k_a]
        x_ref,                                    # VMEM (B, S, F)
        w0_ref, b0_ref, w1_ref, b1_ref, w2_ref, b2_ref,   # BN-folded conv per block
        modwd_ref, modwl_ref, modb_ref,           # mod-gate pieces: (1, 1, H_in) each
        wh_ref,                                   # (hidden, 4*hidden + H_in) = [whh | modW_h]
        wih_ref, bias_ref,                        # (H_in, 4*hidden), (1, 4*hidden)
        clsw_ref, clsb_ref,                       # (hidden, n_cls), (1, n_cls)
        logits_ref):                              # out: (B, n_cls)
    bsz, seq, feat = x_ref.shape
    hidden = wh_ref.shape[0]
    g4 = 4 * hidden

    # ---- ResidualDelayLayer (queue features), kept 2-D (B, S): lane = S ----
    x = x_ref[...]
    k_s = qk_ref[0]
    k_a = qk_ref[1]
    di = feat + IDX_DISTANCE
    ai = feat + IDX_AIRTIME
    dist = x[:, :, di]                             # (B, S)
    air = x[:, :, ai]
    e_s = k_s * dist + EPS_Q
    lam = (air + EPS_Q) / k_a
    rho = jnp.minimum(lam * e_s, 0.99)
    w_q = rho / (1.0 - rho + EPS_Q) * e_s * 0.5
    wn = (w_q - jnp.min(w_q)) / (jnp.max(w_q) - jnp.min(w_q) + EPS_Q)
    l_q = lam * w_q
    ln = (l_q - jnp.min(l_q)) / (jnp.max(l_q) - jnp.min(l_q) + EPS_Q)

    dm = jnp.mean(wn, axis=1, keepdims=True)[:, :, None]   # (B, 1, 1)
    lm = jnp.mean(ln, axis=1, keepdims=True)[:, :, None]

    # ---- CNN blocks, batch-fused: Conv1d(same)+BN(folded)+ReLU+QTSimAM ----
    # 'same' (K=3, pad=1) as three shifted in-register tap matmuls over B*S rows.
    z = x                                          # (B, S, C) running activation (value)
    for w_ref, wb_ref in ((w0_ref, b0_ref), (w1_ref, b1_ref), (w2_ref, b2_ref)):
        kcin, c_out = w_ref.shape
        c_in = kcin // KSIZE
        zero = jnp.zeros((bsz, 1, c_in), jnp.float32)
        z_prev = jnp.concatenate([zero, z[:, :seq - 1, :]], axis=1)   # tap k=0: z[s-1]
        z_next = jnp.concatenate([z[:, 1:, :], zero], axis=1)         # tap k=2: z[s+1]
        w = w_ref[...]                                                # (3*c_in, c_out)
        y = (jnp.dot(z_prev.reshape(bsz * seq, c_in), w[0:c_in, :],
                     preferred_element_type=jnp.float32)
             + jnp.dot(z.reshape(bsz * seq, c_in), w[c_in:2 * c_in, :],
                       preferred_element_type=jnp.float32)
             + jnp.dot(z_next.reshape(bsz * seq, c_in), w[2 * c_in:3 * c_in, :],
                       preferred_element_type=jnp.float32)
             + wb_ref[...])
        y = jnp.maximum(y, 0.0).reshape(bsz, seq, c_out)   # ReLU; Dropout = identity (eval)
        # QTSimAM: per-channel statistics over the sequence axis
        mu = jnp.mean(y, axis=1, keepdims=True)
        var = jnp.mean((y - mu) ** 2, axis=1, keepdims=True)
        z = y * jax.nn.sigmoid(var + dm + 0.5 * lm + E_LAMBDA)

    # ---- QMogrifier LSTM (1 layer) + classifier head ----
    # h-independent part of the mod-gate, hoisted off the recurrent path.
    pre_bias = (wn[:, :, None] * modwd_ref[...] + ln[:, :, None] * modwl_ref[...]
                + modb_ref[...])                   # (B, S, H_in)
    # bf16 operands / f32 accumulation on the serial recurrent matmuls.
    w_h = wh_ref[...].astype(jnp.bfloat16)         # (hidden, 4*hidden + H_in)
    wih = wih_ref[...].astype(jnp.bfloat16)
    bias = bias_ref[...]
    h = jnp.zeros((bsz, hidden), jnp.float32)
    c = jnp.zeros((bsz, hidden), jnp.float32)
    # NOTE: static unroll is fine at S=8; use lax.fori_loop(unroll=True) for long S.
    for t in range(seq):
        hw = jnp.dot(h.astype(jnp.bfloat16), w_h,
                     preferred_element_type=jnp.float32)   # (B, 4H + H_in)
        m = jax.nn.sigmoid(hw[:, g4:] + pre_bias[:, t, :])  # mod gate
        x_t = m * z[:, t, :]
        gates = (jnp.dot(x_t.astype(jnp.bfloat16), wih,
                         preferred_element_type=jnp.float32)
                 + hw[:, 0:g4] + bias)             # (B, 4*hidden) = 128 lanes
        sg = jax.nn.sigmoid(gates)                 # full-vreg EUP pushes, then slice
        th = jnp.tanh(gates)
        i_g = sg[:, 0:hidden]
        f_g = sg[:, hidden:2 * hidden]
        g_g = th[:, 2 * hidden:3 * hidden]
        o_g = sg[:, 3 * hidden:g4]
        c = f_g * c + i_g * g_g
        h = o_g * jnp.tanh(c)
    logits_ref[...] = (jnp.dot(h, clsw_ref[...], preferred_element_type=jnp.float32)
                       + clsb_ref[...])


# ---------------- wrapper: host-side parameter prep + one pallas_call ----------------
@jax.jit
def model_forward(x, params):
    bsz, _, _ = x.shape
    hidden = params["whh"].shape[0]
    h_in = params["wih"].shape[0]
    num_classes = params["clsW"].shape[1]

    # scalar queue parameters -> SMEM
    qk = jnp.concatenate([params["k_s"].reshape(-1), params["k_a"].reshape(-1)])

    # Fold BatchNorm (eval) into conv weight/bias; weights already in im2col layout.
    conv_args = []
    for blk in params["cnn"]:
        w = blk["w"]                               # (K, c_in, c_out)
        k_, ci, co = w.shape
        scale = blk["gamma"][0] * jax.lax.rsqrt(blk["rvar"][0] + BN_EPS)   # (c_out,)
        w_eff = (w * scale[None, None, :]).reshape(k_ * ci, co)
        b_eff = ((blk["b"][0] - blk["rmean"][0]) * scale + blk["beta"][0])[None, :]
        conv_args += [w_eff, b_eff]

    # LSTM: fuse the two h-dependent matmuls; split mod-gate weight rows.
    w_h = jnp.concatenate([params["whh"], params["modW"][:hidden, :]], axis=1)
    modw_d = params["modW"][hidden][None, None, :]          # (1, 1, H_in)
    modw_l = params["modW"][hidden + 1][None, None, :]
    modb = params["modb"].reshape(1, 1, h_in)

    vmem = pl.BlockSpec(memory_space=pltpu.MemorySpace.VMEM)
    smem = pl.BlockSpec(memory_space=pltpu.MemorySpace.SMEM)
    return pl.pallas_call(
        fused_forward_kernel,
        out_shape=jax.ShapeDtypeStruct((bsz, num_classes), jnp.float32),
        in_specs=[smem] + [vmem] * 15,
        out_specs=vmem,
    )(qk, x, *conv_args, modw_d, modw_l, modb, w_h,
      params["wih"], params["bias"], params["clsW"], params["clsb"])


# ---------------- pure-JAX reference (same math, unfolded params) ----------------
def reference_forward(x, params):
    dist = x[:, :, IDX_DISTANCE]
    air = x[:, :, IDX_AIRTIME]
    k_s = params["k_s"][0, 0]
    k_a = params["k_a"][0, 0]
    e_s = k_s * dist + EPS_Q
    lam = (air + EPS_Q) / k_a
    rho = jnp.minimum(lam * e_s, 0.99)
    w_q = rho / (1.0 - rho + EPS_Q) * e_s * 0.5
    wn = (w_q - w_q.min()) / (w_q.max() - w_q.min() + EPS_Q)
    l_q = lam * w_q
    ln = (l_q - l_q.min()) / (l_q.max() - l_q.min() + EPS_Q)
    d_seq = wn[..., None]
    lq_seq = ln[..., None]
    dm = d_seq.mean(axis=1, keepdims=True)
    lm = lq_seq.mean(axis=1, keepdims=True)

    z = x
    for blk in params["cnn"]:
        w = blk["w"]
        k_, _, _ = w.shape
        pad_lo = (k_ - 1) // 2
        zp = jnp.pad(z, ((0, 0), (pad_lo, k_ - 1 - pad_lo), (0, 0)))
        s_ = z.shape[1]
        y = blk["b"][0][None, None, :]
        for k in range(k_):
            y = y + jnp.einsum("bsc,co->bso", zp[:, k:k + s_, :], w[k])
        y = (y - blk["rmean"][0]) * blk["gamma"][0] / jnp.sqrt(blk["rvar"][0] + BN_EPS) \
            + blk["beta"][0]
        y = jnp.maximum(y, 0.0)
        mu = y.mean(axis=1, keepdims=True)
        var = ((y - mu) ** 2).mean(axis=1, keepdims=True)
        e = var + dm + 0.5 * lm + E_LAMBDA
        z = y * jax.nn.sigmoid(e)

    hidden = params["whh"].shape[0]
    h = jnp.zeros((x.shape[0], hidden), jnp.float32)
    c = jnp.zeros((x.shape[0], hidden), jnp.float32)
    for t in range(z.shape[1]):
        gate_in = jnp.concatenate([h, d_seq[:, t], lq_seq[:, t]], axis=1)
        m = jax.nn.sigmoid(gate_in @ params["modW"] + params["modb"][0])
        x_t = m * z[:, t, :]
        gates = x_t @ params["wih"] + h @ params["whh"] + params["bias"][0]
        i_g = jax.nn.sigmoid(gates[:, :hidden])
        f_g = jax.nn.sigmoid(gates[:, hidden:2 * hidden])
        g_g = jnp.tanh(gates[:, 2 * hidden:3 * hidden])
        o_g = jax.nn.sigmoid(gates[:, 3 * hidden:])
        c = f_g * c + i_g * g_g
        h = o_g * jnp.tanh(c)
    return h @ params["clsW"] + params["clsb"][0]


# ---------------- deterministic parameter init ----------------
def init_params(key):
    keys = iter(jax.random.split(key, 32))
    params = {
        "k_s": jnp.ones((1, 1), jnp.float32),   # nn.Parameter(1.0)
        "k_a": jnp.ones((1, 1), jnp.float32),
        "cnn": [],
    }
    ch_in = NUM_FEATURES
    for ch_out in CNN_CHANNELS:
        blk = {
            "w": 0.2 * jax.random.normal(next(keys), (KSIZE, ch_in, ch_out), jnp.float32),
            "b": 0.1 * jax.random.normal(next(keys), (1, ch_out), jnp.float32),
            "gamma": 1.0 + 0.1 * jax.random.normal(next(keys), (1, ch_out), jnp.float32),
            "beta": 0.1 * jax.random.normal(next(keys), (1, ch_out), jnp.float32),
            "rmean": 0.05 * jax.random.normal(next(keys), (1, ch_out), jnp.float32),
            "rvar": 1.0 + 0.1 * jnp.abs(jax.random.normal(next(keys), (1, ch_out), jnp.float32)),
        }
        params["cnn"].append(blk)
        ch_in = ch_out
    h_in = ch_in
    params["modW"] = 0.1 * jax.random.normal(next(keys), (LSTM_HIDDEN + 2, h_in), jnp.float32)
    params["modb"] = 0.1 * jax.random.normal(next(keys), (1, h_in), jnp.float32)
    params["wih"] = 0.1 * jax.random.normal(next(keys), (h_in, 4 * LSTM_HIDDEN), jnp.float32)
    params["whh"] = 0.1 * jax.random.normal(next(keys), (LSTM_HIDDEN, 4 * LSTM_HIDDEN), jnp.float32)
    params["bias"] = 0.1 * jax.random.normal(next(keys), (1, 4 * LSTM_HIDDEN), jnp.float32)
    params["clsW"] = 0.1 * jax.random.normal(next(keys), (LSTM_HIDDEN, NUM_CLASSES), jnp.float32)
    params["clsb"] = 0.1 * jax.random.normal(next(keys), (1, NUM_CLASSES), jnp.float32)
    return params


if __name__ == "__main__":
    root = jax.random.PRNGKey(0)
    kx, kp = jax.random.split(root)
    x = jax.random.normal(kx, (B, S, NUM_FEATURES), jnp.float32)
    params = init_params(kp)

    logits = jax.block_until_ready(model_forward(x, params))
    ref = jax.block_until_ready(reference_forward(x, params))

    assert logits.shape == (B, NUM_CLASSES)
    assert jnp.max(jnp.abs(logits - ref)) < 1e-2, (logits, ref)
    print("KERNEL_OK")
</pallas_src>

<mosaic_0001>
module attributes {stable_mosaic.version = 11 : i64} {
  func.func @fused_forward_kernel(%arg0: memref<2xf32, #tpu.memory_space<smem>>, %arg1: memref<2x8x8xf32, #tpu.memory_space<vmem>>, %arg2: memref<24x8xf32, #tpu.memory_space<vmem>>, %arg3: memref<1x8xf32, #tpu.memory_space<vmem>>, %arg4: memref<24x16xf32, #tpu.memory_space<vmem>>, %arg5: memref<1x16xf32, #tpu.memory_space<vmem>>, %arg6: memref<48x32xf32, #tpu.memory_space<vmem>>, %arg7: memref<1x32xf32, #tpu.memory_space<vmem>>, %arg8: memref<1x1x32xf32, #tpu.memory_space<vmem>>, %arg9: memref<1x1x32xf32, #tpu.memory_space<vmem>>, %arg10: memref<1x1x32xf32, #tpu.memory_space<vmem>>, %arg11: memref<32x160xf32, #tpu.memory_space<vmem>>, %arg12: memref<32x128xf32, #tpu.memory_space<vmem>>, %arg13: memref<1x128xf32, #tpu.memory_space<vmem>>, %arg14: memref<32x4xf32, #tpu.memory_space<vmem>>, %arg15: memref<1x4xf32, #tpu.memory_space<vmem>>, %arg16: memref<2x4xf32, #tpu.memory_space<vmem>>) attributes {dimension_semantics = [], scalar_prefetch = 0 : i64, scratch_operands = 0 : i64, tpu.core_type = #tpu.core_type<tc>} {
    %c0 = arith.constant 0 : index
    %c0_0 = arith.constant 0 : index
    %c0_1 = arith.constant 0 : index
    %0 = vector.load %arg1[%c0, %c0_0, %c0_1] : memref<2x8x8xf32, #tpu.memory_space<vmem>>, vector<2x8x8xf32>
    %c0_2 = arith.constant 0 : index
    %1 = memref.load %arg0[%c0_2] : memref<2xf32, #tpu.memory_space<smem>>
    %c1 = arith.constant 1 : index
    %2 = memref.load %arg0[%c1] : memref<2xf32, #tpu.memory_space<smem>>
    %3 = vector.extract_strided_slice %0 {offsets = [0, 0, 5], sizes = [2, 8, 1], strides = [1, 1, 1]} : vector<2x8x8xf32> to vector<2x8x1xf32>
    %4 = vector.shape_cast %3 : vector<2x8x1xf32> to vector<2x8xf32>
    %5 = vector.extract_strided_slice %0 {offsets = [0, 0, 3], sizes = [2, 8, 1], strides = [1, 1, 1]} : vector<2x8x8xf32> to vector<2x8x1xf32>
    %6 = vector.shape_cast %5 : vector<2x8x1xf32> to vector<2x8xf32>
    %7 = vector.broadcast %1 : f32 to vector<2x8xf32>
    %8 = arith.mulf %7, %4 : vector<2x8xf32>
    %cst = arith.constant 9.99999997E-7 : f32
    %9 = vector.broadcast %cst : f32 to vector<2x8xf32>
    %10 = arith.addf %8, %9 : vector<2x8xf32>
    %cst_3 = arith.constant 9.99999997E-7 : f32
    %11 = vector.broadcast %cst_3 : f32 to vector<2x8xf32>
    %12 = arith.addf %6, %11 : vector<2x8xf32>
    %13 = vector.broadcast %2 : f32 to vector<2x8xf32>
    %14 = arith.divf %12, %13 : vector<2x8xf32>
    %15 = arith.mulf %14, %10 : vector<2x8xf32>
    %cst_4 = arith.constant 9.900000e-01 : f32
    %16 = vector.broadcast %cst_4 : f32 to vector<2x8xf32>
    %17 = arith.minimumf %15, %16 : vector<2x8xf32>
    %cst_5 = arith.constant 1.000000e+00 : f32
    %18 = vector.broadcast %cst_5 : f32 to vector<2x8xf32>
    %19 = arith.subf %18, %17 : vector<2x8xf32>
    %cst_6 = arith.constant 9.99999997E-7 : f32
    %20 = vector.broadcast %cst_6 : f32 to vector<2x8xf32>
    %21 = arith.addf %19, %20 : vector<2x8xf32>
    %22 = arith.divf %17, %21 : vector<2x8xf32>
    %23 = arith.mulf %22, %10 : vector<2x8xf32>
    %cst_7 = arith.constant 5.000000e-01 : f32
    %24 = vector.broadcast %cst_7 : f32 to vector<2x8xf32>
    %25 = arith.mulf %23, %24 : vector<2x8xf32>
    %26 = vector.shape_cast %25 : vector<2x8xf32> to vector<1x2x8xf32>
    %cst_8 = arith.constant dense<0x7F800000> : vector<1xf32>
    %27 = vector.multi_reduction <minimumf>, %26, %cst_8 [1, 2] : vector<1x2x8xf32> to vector<1xf32>
    %28 = vector.shape_cast %27 : vector<1xf32> to vector<1x1x1xf32>
    %29 = vector.extract %28[0, 0, 0] : f32 from vector<1x1x1xf32>
    %30 = vector.broadcast %29 : f32 to vector<2x8xf32>
    %31 = arith.subf %25, %30 : vector<2x8xf32>
    %32 = vector.shape_cast %25 : vector<2x8xf32> to vector<1x2x8xf32>
    %cst_9 = arith.constant dense<0xFF800000> : vector<1xf32>
    %33 = vector.multi_reduction <maximumf>, %32, %cst_9 [1, 2] : vector<1x2x8xf32> to vector<1xf32>
    %34 = vector.shape_cast %33 : vector<1xf32> to vector<1x1x1xf32>
    %35 = vector.extract %34[0, 0, 0] : f32 from vector<1x1x1xf32>
    %36 = vector.shape_cast %25 : vector<2x8xf32> to vector<1x2x8xf32>
    %cst_10 = arith.constant dense<0x7F800000> : vector<1xf32>
    %37 = vector.multi_reduction <minimumf>, %36, %cst_10 [1, 2] : vector<1x2x8xf32> to vector<1xf32>
    %38 = vector.shape_cast %37 : vector<1xf32> to vector<1x1x1xf32>
    %39 = vector.extract %38[0, 0, 0] : f32 from vector<1x1x1xf32>
    %40 = arith.subf %35, %39 : f32
    %cst_11 = arith.constant 9.99999997E-7 : f32
    %41 = arith.addf %40, %cst_11 : f32
    %42 = vector.broadcast %41 : f32 to vector<2x8xf32>
    %43 = arith.divf %31, %42 : vector<2x8xf32>
    %44 = arith.mulf %14, %25 : vector<2x8xf32>
    %45 = vector.shape_cast %44 : vector<2x8xf32> to vector<1x2x8xf32>
    %cst_12 = arith.constant dense<0x7F800000> : vector<1xf32>
    %46 = vector.multi_reduction <minimumf>, %45, %cst_12 [1, 2] : vector<1x2x8xf32> to vector<1xf32>
    %47 = vector.shape_cast %46 : vector<1xf32> to vector<1x1x1xf32>
    %48 = vector.extract %47[0, 0, 0] : f32 from vector<1x1x1xf32>
    %49 = vector.broadcast %48 : f32 to vector<2x8xf32>
    %50 = arith.subf %44, %49 : vector<2x8xf32>
    %51 = vector.shape_cast %44 : vector<2x8xf32> to vector<1x2x8xf32>
    %cst_13 = arith.constant dense<0xFF800000> : vector<1xf32>
    %52 = vector.multi_reduction <maximumf>, %51, %cst_13 [1, 2] : vector<1x2x8xf32> to vector<1xf32>
    %53 = vector.shape_cast %52 : vector<1xf32> to vector<1x1x1xf32>
    %54 = vector.extract %53[0, 0, 0] : f32 from vector<1x1x1xf32>
    %55 = vector.shape_cast %44 : vector<2x8xf32> to vector<1x2x8xf32>
    %cst_14 = arith.constant dense<0x7F800000> : vector<1xf32>
    %56 = vector.multi_reduction <minimumf>, %55, %cst_14 [1, 2] : vector<1x2x8xf32> to vector<1xf32>
    %57 = vector.shape_cast %56 : vector<1xf32> to vector<1x1x1xf32>
    %58 = vector.extract %57[0, 0, 0] : f32 from vector<1x1x1xf32>
    %59 = arith.subf %54, %58 : f32
    %cst_15 = arith.constant 9.99999997E-7 : f32
    %60 = arith.addf %59, %cst_15 : f32
    %61 = vector.broadcast %60 : f32 to vector<2x8xf32>
    %62 = arith.divf %50, %61 : vector<2x8xf32>
    %cst_16 = arith.constant dense<0.000000e+00> : vector<2xf32>
    %63 = vector.multi_reduction <add>, %43, %cst_16 [1] : vector<2x8xf32> to vector<2xf32>
    %64 = vector.shape_cast %63 : vector<2xf32> to vector<2x1xf32>
    %cst_17 = arith.constant 8.000000e+00 : f32
    %65 = vector.broadcast %cst_17 : f32 to vector<2x1xf32>
    %66 = arith.divf %64, %65 : vector<2x1xf32>
    %67 = vector.shape_cast %66 : vector<2x1xf32> to vector<2x1x1xf32>
    %cst_18 = arith.constant dense<0.000000e+00> : vector<2xf32>
    %68 = vector.multi_reduction <add>, %62, %cst_18 [1] : vector<2x8xf32> to vector<2xf32>
    %69 = vector.shape_cast %68 : vector<2xf32> to vector<2x1xf32>
    %cst_19 = arith.constant 8.000000e+00 : f32
    %70 = vector.broadcast %cst_19 : f32 to vector<2x1xf32>
    %71 = arith.divf %69, %70 : vector<2x1xf32>
    %72 = vector.shape_cast %71 : vector<2x1xf32> to vector<2x1x1xf32>
    %cst_20 = arith.constant 0.000000e+00 : f32
    %73 = vector.broadcast %cst_20 : f32 to vector<2x1x8xf32>
    %74 = vector.extract_strided_slice %0 {offsets = [0, 0, 0], sizes = [2, 7, 8], strides = [1, 1, 1]} : vector<2x8x8xf32> to vector<2x7x8xf32>
    %75 = tpu.concatenate %73, %74 in 1 : vector<2x1x8xf32>, vector<2x7x8xf32> -> vector<2x8x8xf32>
    %76 = vector.extract_strided_slice %0 {offsets = [0, 1, 0], sizes = [2, 7, 8], strides = [1, 1, 1]} : vector<2x8x8xf32> to vector<2x7x8xf32>
    %77 = tpu.concatenate %76, %73 in 1 : vector<2x7x8xf32>, vector<2x1x8xf32> -> vector<2x8x8xf32>
    %c0_21 = arith.constant 0 : index
    %c0_22 = arith.constant 0 : index
    %78 = vector.load %arg2[%c0_21, %c0_22] : memref<24x8xf32, #tpu.memory_space<vmem>>, vector<24x8xf32>
    %79 = vector.shape_cast %75 : vector<2x8x8xf32> to vector<16x8xf32>
    %80 = vector.extract_strided_slice %78 {offsets = [0, 0], sizes = [8, 8], strides = [1, 1]} : vector<24x8xf32> to vector<8x8xf32>
    %cst_23 = arith.constant dense<0.000000e+00> : vector<16x8xf32>
    %81 = tpu.matmul %79, %80, %cst_23 {dimension_numbers = #tpu.dot_dimension_numbers<[1], [0], [0], [1], [0, 0, 1, 1], [], []>} : vector<16x8xf32>, vector<8x8xf32>, vector<16x8xf32> -> vector<16x8xf32>
    %82 = vector.shape_cast %0 : vector<2x8x8xf32> to vector<16x8xf32>
    %83 = vector.extract_strided_slice %78 {offsets = [8, 0], sizes = [8, 8], strides = [1, 1]} : vector<24x8xf32> to vector<8x8xf32>
    %cst_24 = arith.constant dense<0.000000e+00> : vector<16x8xf32>
    %84 = tpu.matmul %82, %83, %cst_24 {dimension_numbers = #tpu.dot_dimension_numbers<[1], [0], [0], [1], [0, 0, 1, 1], [], []>} : vector<16x8xf32>, vector<8x8xf32>, vector<16x8xf32> -> vector<16x8xf32>
    %85 = arith.addf %81, %84 : vector<16x8xf32>
    %86 = vector.shape_cast %77 : vector<2x8x8xf32> to vector<16x8xf32>
    %87 = vector.extract_strided_slice %78 {offsets = [16, 0], sizes = [8, 8], strides = [1, 1]} : vector<24x8xf32> to vector<8x8xf32>
    %cst_25 = arith.constant dense<0.000000e+00> : vector<16x8xf32>
    %88 = tpu.matmul %86, %87, %cst_25 {dimension_numbers = #tpu.dot_dimension_numbers<[1], [0], [0], [1], [0, 0, 1, 1], [], []>} : vector<16x8xf32>, vector<8x8xf32>, vector<16x8xf32> -> vector<16x8xf32>
    %89 = arith.addf %85, %88 : vector<16x8xf32>
    %c0_26 = arith.constant 0 : index
    %c0_27 = arith.constant 0 : index
    %90 = vector.load %arg3[%c0_26, %c0_27] : memref<1x8xf32, #tpu.memory_space<vmem>>, vector<1x8xf32>
    %91 = vector.broadcast %90 : vector<1x8xf32> to vector<16x8xf32>
    %92 = arith.addf %89, %91 : vector<16x8xf32>
    %cst_28 = arith.constant 0.000000e+00 : f32
    %93 = vector.broadcast %cst_28 : f32 to vector<16x8xf32>
    %94 = arith.maximumf %92, %93 : vector<16x8xf32>
    %95 = vector.shape_cast %94 : vector<16x8xf32> to vector<2x8x8xf32>
    %cst_29 = arith.constant dense<0.000000e+00> : vector<2x8xf32>
    %96 = vector.multi_reduction <add>, %95, %cst_29 [1] : vector<2x8x8xf32> to vector<2x8xf32>
    %97 = vector.shape_cast %96 : vector<2x8xf32> to vector<2x1x8xf32>
    %cst_30 = arith.constant 8.000000e+00 : f32
    %98 = vector.broadcast %cst_30 : f32 to vector<2x1x8xf32>
    %99 = arith.divf %97, %98 : vector<2x1x8xf32>
    %100 = vector.broadcast %99 : vector<2x1x8xf32> to vector<2x8x8xf32>
    %101 = arith.subf %95, %100 : vector<2x8x8xf32>
    %102 = arith.mulf %101, %101 : vector<2x8x8xf32>
    %cst_31 = arith.constant dense<0.000000e+00> : vector<2x8xf32>
    %103 = vector.multi_reduction <add>, %102, %cst_31 [1] : vector<2x8x8xf32> to vector<2x8xf32>
    %104 = vector.shape_cast %103 : vector<2x8xf32> to vector<2x1x8xf32>
    %cst_32 = arith.constant 8.000000e+00 : f32
    %105 = vector.broadcast %cst_32 : f32 to vector<2x1x8xf32>
    %106 = arith.divf %104, %105 : vector<2x1x8xf32>
    %107 = vector.broadcast %67 : vector<2x1x1xf32> to vector<2x1x8xf32>
    %108 = arith.addf %106, %107 : vector<2x1x8xf32>
    %cst_33 = arith.constant 5.000000e-01 : f32
    %109 = vector.broadcast %cst_33 : f32 to vector<2x1x1xf32>
    %110 = arith.mulf %109, %72 : vector<2x1x1xf32>
    %111 = vector.broadcast %110 : vector<2x1x1xf32> to vector<2x1x8xf32>
    %112 = arith.addf %108, %111 : vector<2x1x8xf32>
    %cst_34 = arith.constant 9.99999974E-5 : f32
    %113 = vector.broadcast %cst_34 : f32 to vector<2x1x8xf32>
    %114 = arith.addf %112, %113 : vector<2x1x8xf32>
    %115 = arith.negf %114 : vector<2x1x8xf32>
    %116 = math.exp %115 : vector<2x1x8xf32>
    %cst_35 = arith.constant 1.000000e+00 : f32
    %117 = vector.broadcast %cst_35 : f32 to vector<2x1x8xf32>
    %118 = arith.addf %117, %116 : vector<2x1x8xf32>
    %119 = arith.divf %117, %118 : vector<2x1x8xf32>
    %120 = vector.broadcast %119 : vector<2x1x8xf32> to vector<2x8x8xf32>
    %121 = arith.mulf %95, %120 : vector<2x8x8xf32>
    %cst_36 = arith.constant 0.000000e+00 : f32
    %122 = vector.broadcast %cst_36 : f32 to vector<2x1x8xf32>
    %123 = vector.extract_strided_slice %121 {offsets = [0, 0, 0], sizes = [2, 7, 8], strides = [1, 1, 1]} : vector<2x8x8xf32> to vector<2x7x8xf32>
    %124 = tpu.concatenate %122, %123 in 1 : vector<2x1x8xf32>, vector<2x7x8xf32> -> vector<2x8x8xf32>
    %125 = vector.extract_strided_slice %121 {offsets = [0, 1, 0], sizes = [2, 7, 8], strides = [1, 1, 1]} : vector<2x8x8xf32> to vector<2x7x8xf32>
    %126 = tpu.concatenate %125, %122 in 1 : vector<2x7x8xf32>, vector<2x1x8xf32> -> vector<2x8x8xf32>
    %c0_37 = arith.constant 0 : index
    %c0_38 = arith.constant 0 : index
    %127 = vector.load %arg4[%c0_37, %c0_38] : memref<24x16xf32, #tpu.memory_space<vmem>>, vector<24x16xf32>
    %128 = vector.shape_cast %124 : vector<2x8x8xf32> to vector<16x8xf32>
    %129 = vector.extract_strided_slice %127 {offsets = [0, 0], sizes = [8, 16], strides = [1, 1]} : vector<24x16xf32> to vector<8x16xf32>
    %cst_39 = arith.constant dense<0.000000e+00> : vector<16x16xf32>
    %130 = tpu.matmul %128, %129, %cst_39 {dimension_numbers = #tpu.dot_dimension_numbers<[1], [0], [0], [1], [0, 0, 1, 1], [], []>} : vector<16x8xf32>, vector<8x16xf32>, vector<16x16xf32> -> vector<16x16xf32>
    %131 = vector.shape_cast %121 : vector<2x8x8xf32> to vector<16x8xf32>
    %132 = vector.extract_strided_slice %127 {offsets = [8, 0], sizes = [8, 16], strides = [1, 1]} : vector<24x16xf32> to vector<8x16xf32>
    %cst_40 = arith.constant dense<0.000000e+00> : vector<16x16xf32>
    %133 = tpu.matmul %131, %132, %cst_40 {dimension_numbers = #tpu.dot_dimension_numbers<[1], [0], [0], [1], [0, 0, 1, 1], [], []>} : vector<16x8xf32>, vector<8x16xf32>, vector<16x16xf32> -> vector<16x16xf32>
    %134 = arith.addf %130, %133 : vector<16x16xf32>
    %135 = vector.shape_cast %126 : vector<2x8x8xf32> to vector<16x8xf32>
    %136 = vector.extract_strided_slice %127 {offsets = [16, 0], sizes = [8, 16], strides = [1, 1]} : vector<24x16xf32> to vector<8x16xf32>
    %cst_41 = arith.constant dense<0.000000e+00> : vector<16x16xf32>
    %137 = tpu.matmul %135, %136, %cst_41 {dimension_numbers = #tpu.dot_dimension_numbers<[1], [0], [0], [1], [0, 0, 1, 1], [], []>} : vector<16x8xf32>, vector<8x16xf32>, vector<16x16xf32> -> vector<16x16xf32>
    %138 = arith.addf %134, %137 : vector<16x16xf32>
    %c0_42 = arith.constant 0 : index
    %c0_43 = arith.constant 0 : index
    %139 = vector.load %arg5[%c0_42, %c0_43] : memref<1x16xf32, #tpu.memory_space<vmem>>, vector<1x16xf32>
    %140 = vector.broadcast %139 : vector<1x16xf32> to vector<16x16xf32>
    %141 = arith.addf %138, %140 : vector<16x16xf32>
    %cst_44 = arith.constant 0.000000e+00 : f32
    %142 = vector.broadcast %cst_44 : f32 to vector<16x16xf32>
    %143 = arith.maximumf %141, %142 : vector<16x16xf32>
    %144 = vector.shape_cast %143 : vector<16x16xf32> to vector<2x8x16xf32>
    %cst_45 = arith.constant dense<0.000000e+00> : vector<2x16xf32>
    %145 = vector.multi_reduction <add>, %144, %cst_45 [1] : vector<2x8x16xf32> to vector<2x16xf32>
    %146 = vector.shape_cast %145 : vector<2x16xf32> to vector<2x1x16xf32>
    %cst_46 = arith.constant 8.000000e+00 : f32
    %147 = vector.broadcast %cst_46 : f32 to vector<2x1x16xf32>
    %148 = arith.divf %146, %147 : vector<2x1x16xf32>
    %149 = vector.broadcast %148 : vector<2x1x16xf32> to vector<2x8x16xf32>
    %150 = arith.subf %144, %149 : vector<2x8x16xf32>
    %151 = arith.mulf %150, %150 : vector<2x8x16xf32>
    %cst_47 = arith.constant dense<0.000000e+00> : vector<2x16xf32>
    %152 = vector.multi_reduction <add>, %151, %cst_47 [1] : vector<2x8x16xf32> to vector<2x16xf32>
    %153 = vector.shape_cast %152 : vector<2x16xf32> to vector<2x1x16xf32>
    %cst_48 = arith.constant 8.000000e+00 : f32
    %154 = vector.broadcast %cst_48 : f32 to vector<2x1x16xf32>
    %155 = arith.divf %153, %154 : vector<2x1x16xf32>
    %156 = vector.broadcast %67 : vector<2x1x1xf32> to vector<2x1x16xf32>
    %157 = arith.addf %155, %156 : vector<2x1x16xf32>
    %cst_49 = arith.constant 5.000000e-01 : f32
    %158 = vector.broadcast %cst_49 : f32 to vector<2x1x1xf32>
    %159 = arith.mulf %158, %72 : vector<2x1x1xf32>
    %160 = vector.broadcast %159 : vector<2x1x1xf32> to vector<2x1x16xf32>
    %161 = arith.addf %157, %160 : vector<2x1x16xf32>
    %cst_50 = arith.constant 9.99999974E-5 : f32
    %162 = vector.broadcast %cst_50 : f32 to vector<2x1x16xf32>
    %163 = arith.addf %161, %162 : vector<2x1x16xf32>
    %164 = arith.negf %163 : vector<2x1x16xf32>
    %165 = math.exp %164 : vector<2x1x16xf32>
    %cst_51 = arith.constant 1.000000e+00 : f32
    %166 = vector.broadcast %cst_51 : f32 to vector<2x1x16xf32>
    %167 = arith.addf %166, %165 : vector<2x1x16xf32>
    %168 = arith.divf %166, %167 : vector<2x1x16xf32>
    %169 = vector.broadcast %168 : vector<2x1x16xf32> to vector<2x8x16xf32>
    %170 = arith.mulf %144, %169 : vector<2x8x16xf32>
    %cst_52 = arith.constant 0.000000e+00 : f32
    %171 = vector.broadcast %cst_52 : f32 to vector<2x1x16xf32>
    %172 = vector.extract_strided_slice %170 {offsets = [0, 0, 0], sizes = [2, 7, 16], strides = [1, 1, 1]} : vector<2x8x16xf32> to vector<2x7x16xf32>
    %173 = tpu.concatenate %171, %172 in 1 : vector<2x1x16xf32>, vector<2x7x16xf32> -> vector<2x8x16xf32>
    %174 = vector.extract_strided_slice %170 {offsets = [0, 1, 0], sizes = [2, 7, 16], strides = [1, 1, 1]} : vector<2x8x16xf32> to vector<2x7x16xf32>
    %175 = tpu.concatenate %174, %171 in 1 : vector<2x7x16xf32>, vector<2x1x16xf32> -> vector<2x8x16xf32>
    %c0_53 = arith.constant 0 : index
    %c0_54 = arith.constant 0 : index
    %176 = vector.load %arg6[%c0_53, %c0_54] : memref<48x32xf32, #tpu.memory_space<vmem>>, vector<48x32xf32>
    %177 = vector.shape_cast %173 : vector<2x8x16xf32> to vector<16x16xf32>
    %178 = vector.extract_strided_slice %176 {offsets = [0, 0], sizes = [16, 32], strides = [1, 1]} : vector<48x32xf32> to vector<16x32xf32>
    %cst_55 = arith.constant dense<0.000000e+00> : vector<16x32xf32>
    %179 = tpu.matmul %177, %178, %cst_55 {dimension_numbers = #tpu.dot_dimension_numbers<[1], [0], [0], [1], [0, 0, 1, 1], [], []>} : vector<16x16xf32>, vector<16x32xf32>, vector<16x32xf32> -> vector<16x32xf32>
    %180 = vector.shape_cast %170 : vector<2x8x16xf32> to vector<16x16xf32>
    %181 = vector.extract_strided_slice %176 {offsets = [16, 0], sizes = [16, 32], strides = [1, 1]} : vector<48x32xf32> to vector<16x32xf32>
    %cst_56 = arith.constant dense<0.000000e+00> : vector<16x32xf32>
    %182 = tpu.matmul %180, %181, %cst_56 {dimension_numbers = #tpu.dot_dimension_numbers<[1], [0], [0], [1], [0, 0, 1, 1], [], []>} : vector<16x16xf32>, vector<16x32xf32>, vector<16x32xf32> -> vector<16x32xf32>
    %183 = arith.addf %179, %182 : vector<16x32xf32>
    %184 = vector.shape_cast %175 : vector<2x8x16xf32> to vector<16x16xf32>
    %185 = vector.extract_strided_slice %176 {offsets = [32, 0], sizes = [16, 32], strides = [1, 1]} : vector<48x32xf32> to vector<16x32xf32>
    %cst_57 = arith.constant dense<0.000000e+00> : vector<16x32xf32>
    %186 = tpu.matmul %184, %185, %cst_57 {dimension_numbers = #tpu.dot_dimension_numbers<[1], [0], [0], [1], [0, 0, 1, 1], [], []>} : vector<16x16xf32>, vector<16x32xf32>, vector<16x32xf32> -> vector<16x32xf32>
    %187 = arith.addf %183, %186 : vector<16x32xf32>
    %c0_58 = arith.constant 0 : index
    %c0_59 = arith.constant 0 : index
    %188 = vector.load %arg7[%c0_58, %c0_59] : memref<1x32xf32, #tpu.memory_space<vmem>>, vector<1x32xf32>
    %189 = vector.broadcast %188 : vector<1x32xf32> to vector<16x32xf32>
    %190 = arith.addf %187, %189 : vector<16x32xf32>
    %cst_60 = arith.constant 0.000000e+00 : f32
    %191 = vector.broadcast %cst_60 : f32 to vector<16x32xf32>
    %192 = arith.maximumf %190, %191 : vector<16x32xf32>
    %193 = vector.shape_cast %192 : vector<16x32xf32> to vector<2x8x32xf32>
    %cst_61 = arith.constant dense<0.000000e+00> : vector<2x32xf32>
    %194 = vector.multi_reduction <add>, %193, %cst_61 [1] : vector<2x8x32xf32> to vector<2x32xf32>
    %195 = vector.shape_cast %194 : vector<2x32xf32> to vector<2x1x32xf32>
    %cst_62 = arith.constant 8.000000e+00 : f32
    %196 = vector.broadcast %cst_62 : f32 to vector<2x1x32xf32>
    %197 = arith.divf %195, %196 : vector<2x1x32xf32>
    %198 = vector.broadcast %197 : vector<2x1x32xf32> to vector<2x8x32xf32>
    %199 = arith.subf %193, %198 : vector<2x8x32xf32>
    %200 = arith.mulf %199, %199 : vector<2x8x32xf32>
    %cst_63 = arith.constant dense<0.000000e+00> : vector<2x32xf32>
    %201 = vector.multi_reduction <add>, %200, %cst_63 [1] : vector<2x8x32xf32> to vector<2x32xf32>
    %202 = vector.shape_cast %201 : vector<2x32xf32> to vector<2x1x32xf32>
    %cst_64 = arith.constant 8.000000e+00 : f32
    %203 = vector.broadcast %cst_64 : f32 to vector<2x1x32xf32>
    %204 = arith.divf %202, %203 : vector<2x1x32xf32>
    %205 = vector.broadcast %67 : vector<2x1x1xf32> to vector<2x1x32xf32>
    %206 = arith.addf %204, %205 : vector<2x1x32xf32>
    %cst_65 = arith.constant 5.000000e-01 : f32
    %207 = vector.broadcast %cst_65 : f32 to vector<2x1x1xf32>
    %208 = arith.mulf %207, %72 : vector<2x1x1xf32>
    %209 = vector.broadcast %208 : vector<2x1x1xf32> to vector<2x1x32xf32>
    %210 = arith.addf %206, %209 : vector<2x1x32xf32>
    %cst_66 = arith.constant 9.99999974E-5 : f32
    %211 = vector.broadcast %cst_66 : f32 to vector<2x1x32xf32>
    %212 = arith.addf %210, %211 : vector<2x1x32xf32>
    %213 = arith.negf %212 : vector<2x1x32xf32>
    %214 = math.exp %213 : vector<2x1x32xf32>
    %cst_67 = arith.constant 1.000000e+00 : f32
    %215 = vector.broadcast %cst_67 : f32 to vector<2x1x32xf32>
    %216 = arith.addf %215, %214 : vector<2x1x32xf32>
    %217 = arith.divf %215, %216 : vector<2x1x32xf32>
    %218 = vector.broadcast %217 : vector<2x1x32xf32> to vector<2x8x32xf32>
    %219 = arith.mulf %193, %218 : vector<2x8x32xf32>
    %220 = vector.shape_cast %43 : vector<2x8xf32> to vector<2x8x1xf32>
    %c0_68 = arith.constant 0 : index
    %c0_69 = arith.constant 0 : index
    %c0_70 = arith.constant 0 : index
    %221 = vector.load %arg8[%c0_68, %c0_69, %c0_70] : memref<1x1x32xf32, #tpu.memory_space<vmem>>, vector<1x1x32xf32>
    %222 = vector.broadcast %220 : vector<2x8x1xf32> to vector<2x8x32xf32>
    %223 = vector.broadcast %221 : vector<1x1x32xf32> to vector<2x8x32xf32>
    %224 = arith.mulf %222, %223 : vector<2x8x32xf32>
    %225 = vector.shape_cast %62 : vector<2x8xf32> to vector<2x8x1xf32>
    %c0_71 = arith.constant 0 : index
    %c0_72 = arith.constant 0 : index
    %c0_73 = arith.constant 0 : index
    %226 = vector.load %arg9[%c0_71, %c0_72, %c0_73] : memref<1x1x32xf32, #tpu.memory_space<vmem>>, vector<1x1x32xf32>
    %227 = vector.broadcast %225 : vector<2x8x1xf32> to vector<2x8x32xf32>
    %228 = vector.broadcast %226 : vector<1x1x32xf32> to vector<2x8x32xf32>
    %229 = arith.mulf %227, %228 : vector<2x8x32xf32>
    %230 = arith.addf %224, %229 : vector<2x8x32xf32>
    %c0_74 = arith.constant 0 : index
    %c0_75 = arith.constant 0 : index
    %c0_76 = arith.constant 0 : index
    %231 = vector.load %arg10[%c0_74, %c0_75, %c0_76] : memref<1x1x32xf32, #tpu.memory_space<vmem>>, vector<1x1x32xf32>
    %232 = vector.broadcast %231 : vector<1x1x32xf32> to vector<2x8x32xf32>
    %233 = arith.addf %230, %232 : vector<2x8x32xf32>
    %c0_77 = arith.constant 0 : index
    %c0_78 = arith.constant 0 : index
    %234 = vector.load %arg11[%c0_77, %c0_78] : memref<32x160xf32, #tpu.memory_space<vmem>>, vector<32x160xf32>
    %235 = arith.truncf %234 : vector<32x160xf32> to vector<32x160xbf16>
    %c0_79 = arith.constant 0 : index
    %c0_80 = arith.constant 0 : index
    %236 = vector.load %arg12[%c0_79, %c0_80] : memref<32x128xf32, #tpu.memory_space<vmem>>, vector<32x128xf32>
    %237 = arith.truncf %236 : vector<32x128xf32> to vector<32x128xbf16>
    %c0_81 = arith.constant 0 : index
    %c0_82 = arith.constant 0 : index
    %238 = vector.load %arg13[%c0_81, %c0_82] : memref<1x128xf32, #tpu.memory_space<vmem>>, vector<1x128xf32>
    %cst_83 = arith.constant 0.000000e+00 : f32
    %239 = vector.broadcast %cst_83 : f32 to vector<2x32xf32>
    %cst_84 = arith.constant 0.000000e+00 : f32
    %240 = vector.broadcast %cst_84 : f32 to vector<2x32xf32>
    %241 = arith.truncf %239 : vector<2x32xf32> to vector<2x32xbf16>
    %cst_85 = arith.constant dense<0.000000e+00> : vector<2x160xf32>
    %242 = tpu.matmul %241, %235, %cst_85 {dimension_numbers = #tpu.dot_dimension_numbers<[1], [0], [0], [1], [0, 0, 1, 1], [], []>} : vector<2x32xbf16>, vector<32x160xbf16>, vector<2x160xf32> -> vector<2x160xf32>
    %243 = vector.extract_strided_slice %242 {offsets = [0, 128], sizes = [2, 32], strides = [1, 1]} : vector<2x160xf32> to vector<2x32xf32>
    %244 = vector.extract_strided_slice %233 {offsets = [0, 0, 0], sizes = [2, 1, 32], strides = [1, 1, 1]} : vector<2x8x32xf32> to vector<2x1x32xf32>
    %245 = vector.shape_cast %244 : vector<2x1x32xf32> to vector<2x32xf32>
    %246 = arith.addf %243, %245 : vector<2x32xf32>
    %247 = arith.negf %246 : vector<2x32xf32>
    %248 = math.exp %247 : vector<2x32xf32>
    %cst_86 = arith.constant 1.000000e+00 : f32
    %249 = vector.broadcast %cst_86 : f32 to vector<2x32xf32>
    %250 = arith.addf %249, %248 : vector<2x32xf32>
    %251 = arith.divf %249, %250 : vector<2x32xf32>
    %252 = vector.extract_strided_slice %219 {offsets = [0, 0, 0], sizes = [2, 1, 32], strides = [1, 1, 1]} : vector<2x8x32xf32> to vector<2x1x32xf32>
    %253 = vector.shape_cast %252 : vector<2x1x32xf32> to vector<2x32xf32>
    %254 = arith.mulf %251, %253 : vector<2x32xf32>
    %255 = arith.truncf %254 : vector<2x32xf32> to vector<2x32xbf16>
    %cst_87 = arith.constant dense<0.000000e+00> : vector<2x128xf32>
    %256 = tpu.matmul %255, %237, %cst_87 {dimension_numbers = #tpu.dot_dimension_numbers<[1], [0], [0], [1], [0, 0, 1, 1], [], []>} : vector<2x32xbf16>, vector<32x128xbf16>, vector<2x128xf32> -> vector<2x128xf32>
    %257 = vector.extract_strided_slice %242 {offsets = [0, 0], sizes = [2, 128], strides = [1, 1]} : vector<2x160xf32> to vector<2x128xf32>
    %258 = arith.addf %256, %257 : vector<2x128xf32>
    %259 = vector.broadcast %238 : vector<1x128xf32> to vector<2x128xf32>
    %260 = arith.addf %258, %259 : vector<2x128xf32>
    %261 = arith.negf %260 : vector<2x128xf32>
    %262 = math.exp %261 : vector<2x128xf32>
    %cst_88 = arith.constant 1.000000e+00 : f32
    %263 = vector.broadcast %cst_88 : f32 to vector<2x128xf32>
    %264 = arith.addf %263, %262 : vector<2x128xf32>
    %265 = arith.divf %263, %264 : vector<2x128xf32>
    %266 = math.tanh %260 : vector<2x128xf32>
    %267 = vector.extract_strided_slice %265 {offsets = [0, 0], sizes = [2, 32], strides = [1, 1]} : vector<2x128xf32> to vector<2x32xf32>
    %268 = vector.extract_strided_slice %265 {offsets = [0, 32], sizes = [2, 32], strides = [1, 1]} : vector<2x128xf32> to vector<2x32xf32>
    %269 = vector.extract_strided_slice %266 {offsets = [0, 64], sizes = [2, 32], strides = [1, 1]} : vector<2x128xf32> to vector<2x32xf32>
    %270 = vector.extract_strided_slice %265 {offsets = [0, 96], sizes = [2, 32], strides = [1, 1]} : vector<2x128xf32> to vector<2x32xf32>
    %271 = arith.mulf %268, %240 : vector<2x32xf32>
    %272 = arith.mulf %267, %269 : vector<2x32xf32>
    %273 = arith.addf %271, %272 : vector<2x32xf32>
    %274 = math.tanh %273 : vector<2x32xf32>
    %275 = arith.mulf %270, %274 : vector<2x32xf32>
    %276 = arith.truncf %275 : vector<2x32xf32> to vector<2x32xbf16>
    %cst_89 = arith.constant dense<0.000000e+00> : vector<2x160xf32>
    %277 = tpu.matmul %276, %235, %cst_89 {dimension_numbers = #tpu.dot_dimension_numbers<[1], [0], [0], [1], [0, 0, 1, 1], [], []>} : vector<2x32xbf16>, vector<32x160xbf16>, vector<2x160xf32> -> vector<2x160xf32>
    %278 = vector.extract_strided_slice %277 {offsets = [0, 128], sizes = [2, 32], strides = [1, 1]} : vector<2x160xf32> to vector<2x32xf32>
    %279 = vector.extract_strided_slice %233 {offsets = [0, 1, 0], sizes = [2, 1, 32], strides = [1, 1, 1]} : vector<2x8x32xf32> to vector<2x1x32xf32>
    %280 = vector.shape_cast %279 : vector<2x1x32xf32> to vector<2x32xf32>
    %281 = arith.addf %278, %280 : vector<2x32xf32>
    %282 = arith.negf %281 : vector<2x32xf32>
    %283 = math.exp %282 : vector<2x32xf32>
    %cst_90 = arith.constant 1.000000e+00 : f32
    %284 = vector.broadcast %cst_90 : f32 to vector<2x32xf32>
    %285 = arith.addf %284, %283 : vector<2x32xf32>
    %286 = arith.divf %284, %285 : vector<2x32xf32>
    %287 = vector.extract_strided_slice %219 {offsets = [0, 1, 0], sizes = [2, 1, 32], strides = [1, 1, 1]} : vector<2x8x32xf32> to vector<2x1x32xf32>
    %288 = vector.shape_cast %287 : vector<2x1x32xf32> to vector<2x32xf32>
    %289 = arith.mulf %286, %288 : vector<2x32xf32>
    %290 = arith.truncf %289 : vector<2x32xf32> to vector<2x32xbf16>
    %cst_91 = arith.constant dense<0.000000e+00> : vector<2x128xf32>
    %291 = tpu.matmul %290, %237, %cst_91 {dimension_numbers = #tpu.dot_dimension_numbers<[1], [0], [0], [1], [0, 0, 1, 1], [], []>} : vector<2x32xbf16>, vector<32x128xbf16>, vector<2x128xf32> -> vector<2x128xf32>
    %292 = vector.extract_strided_slice %277 {offsets = [0, 0], sizes = [2, 128], strides = [1, 1]} : vector<2x160xf32> to vector<2x128xf32>
    %293 = arith.addf %291, %292 : vector<2x128xf32>
    %294 = vector.broadcast %238 : vector<1x128xf32> to vector<2x128xf32>
    %295 = arith.addf %293, %294 : vector<2x128xf32>
    %296 = arith.negf %295 : vector<2x128xf32>
    %297 = math.exp %296 : vector<2x128xf32>
    %cst_92 = arith.constant 1.000000e+00 : f32
    %298 = vector.broadcast %cst_92 : f32 to vector<2x128xf32>
    %299 = arith.addf %298, %297 : vector<2x128xf32>
    %300 = arith.divf %298, %299 : vector<2x128xf32>
    %301 = math.tanh %295 : vector<2x128xf32>
    %302 = vector.extract_strided_slice %300 {offsets = [0, 0], sizes = [2, 32], strides = [1, 1]} : vector<2x128xf32> to vector<2x32xf32>
    %303 = vector.extract_strided_slice %300 {offsets = [0, 32], sizes = [2, 32], strides = [1, 1]} : vector<2x128xf32> to vector<2x32xf32>
    %304 = vector.extract_strided_slice %301 {offsets = [0, 64], sizes = [2, 32], strides = [1, 1]} : vector<2x128xf32> to vector<2x32xf32>
    %305 = vector.extract_strided_slice %300 {offsets = [0, 96], sizes = [2, 32], strides = [1, 1]} : vector<2x128xf32> to vector<2x32xf32>
    %306 = arith.mulf %303, %273 : vector<2x32xf32>
    %307 = arith.mulf %302, %304 : vector<2x32xf32>
    %308 = arith.addf %306, %307 : vector<2x32xf32>
    %309 = math.tanh %308 : vector<2x32xf32>
    %310 = arith.mulf %305, %309 : vector<2x32xf32>
    %311 = arith.truncf %310 : vector<2x32xf32> to vector<2x32xbf16>
    %cst_93 = arith.constant dense<0.000000e+00> : vector<2x160xf32>
    %312 = tpu.matmul %311, %235, %cst_93 {dimension_numbers = #tpu.dot_dimension_numbers<[1], [0], [0], [1], [0, 0, 1, 1], [], []>} : vector<2x32xbf16>, vector<32x160xbf16>, vector<2x160xf32> -> vector<2x160xf32>
    %313 = vector.extract_strided_slice %312 {offsets = [0, 128], sizes = [2, 32], strides = [1, 1]} : vector<2x160xf32> to vector<2x32xf32>
    %314 = vector.extract_strided_slice %233 {offsets = [0, 2, 0], sizes = [2, 1, 32], strides = [1, 1, 1]} : vector<2x8x32xf32> to vector<2x1x32xf32>
    %315 = vector.shape_cast %314 : vector<2x1x32xf32> to vector<2x32xf32>
    %316 = arith.addf %313, %315 : vector<2x32xf32>
    %317 = arith.negf %316 : vector<2x32xf32>
    %318 = math.exp %317 : vector<2x32xf32>
    %cst_94 = arith.constant 1.000000e+00 : f32
    %319 = vector.broadcast %cst_94 : f32 to vector<2x32xf32>
    %320 = arith.addf %319, %318 : vector<2x32xf32>
    %321 = arith.divf %319, %320 : vector<2x32xf32>
    %322 = vector.extract_strided_slice %219 {offsets = [0, 2, 0], sizes = [2, 1, 32], strides = [1, 1, 1]} : vector<2x8x32xf32> to vector<2x1x32xf32>
    %323 = vector.shape_cast %322 : vector<2x1x32xf32> to vector<2x32xf32>
    %324 = arith.mulf %321, %323 : vector<2x32xf32>
    %325 = arith.truncf %324 : vector<2x32xf32> to vector<2x32xbf16>
    %cst_95 = arith.constant dense<0.000000e+00> : vector<2x128xf32>
    %326 = tpu.matmul %325, %237, %cst_95 {dimension_numbers = #tpu.dot_dimension_numbers<[1], [0], [0], [1], [0, 0, 1, 1], [], []>} : vector<2x32xbf16>, vector<32x128xbf16>, vector<2x128xf32> -> vector<2x128xf32>
    %327 = vector.extract_strided_slice %312 {offsets = [0, 0], sizes = [2, 128], strides = [1, 1]} : vector<2x160xf32> to vector<2x128xf32>
    %328 = arith.addf %326, %327 : vector<2x128xf32>
    %329 = vector.broadcast %238 : vector<1x128xf32> to vector<2x128xf32>
    %330 = arith.addf %328, %329 : vector<2x128xf32>
    %331 = arith.negf %330 : vector<2x128xf32>
    %332 = math.exp %331 : vector<2x128xf32>
    %cst_96 = arith.constant 1.000000e+00 : f32
    %333 = vector.broadcast %cst_96 : f32 to vector<2x128xf32>
    %334 = arith.addf %333, %332 : vector<2x128xf32>
    %335 = arith.divf %333, %334 : vector<2x128xf32>
    %336 = math.tanh %330 : vector<2x128xf32>
    %337 = vector.extract_strided_slice %335 {offsets = [0, 0], sizes = [2, 32], strides = [1, 1]} : vector<2x128xf32> to vector<2x32xf32>
    %338 = vector.extract_strided_slice %335 {offsets = [0, 32], sizes = [2, 32], strides = [1, 1]} : vector<2x128xf32> to vector<2x32xf32>
    %339 = vector.extract_strided_slice %336 {offsets = [0, 64], sizes = [2, 32], strides = [1, 1]} : vector<2x128xf32> to vector<2x32xf32>
    %340 = vector.extract_strided_slice %335 {offsets = [0, 96], sizes = [2, 32], strides = [1, 1]} : vector<2x128xf32> to vector<2x32xf32>
    %341 = arith.mulf %338, %308 : vector<2x32xf32>
    %342 = arith.mulf %337, %339 : vector<2x32xf32>
    %343 = arith.addf %341, %342 : vector<2x32xf32>
    %344 = math.tanh %343 : vector<2x32xf32>
    %345 = arith.mulf %340, %344 : vector<2x32xf32>
    %346 = arith.truncf %345 : vector<2x32xf32> to vector<2x32xbf16>
    %cst_97 = arith.constant dense<0.000000e+00> : vector<2x160xf32>
    %347 = tpu.matmul %346, %235, %cst_97 {dimension_numbers = #tpu.dot_dimension_numbers<[1], [0], [0], [1], [0, 0, 1, 1], [], []>} : vector<2x32xbf16>, vector<32x160xbf16>, vector<2x160xf32> -> vector<2x160xf32>
    %348 = vector.extract_strided_slice %347 {offsets = [0, 128], sizes = [2, 32], strides = [1, 1]} : vector<2x160xf32> to vector<2x32xf32>
    %349 = vector.extract_strided_slice %233 {offsets = [0, 3, 0], sizes = [2, 1, 32], strides = [1, 1, 1]} : vector<2x8x32xf32> to vector<2x1x32xf32>
    %350 = vector.shape_cast %349 : vector<2x1x32xf32> to vector<2x32xf32>
    %351 = arith.addf %348, %350 : vector<2x32xf32>
    %352 = arith.negf %351 : vector<2x32xf32>
    %353 = math.exp %352 : vector<2x32xf32>
    %cst_98 = arith.constant 1.000000e+00 : f32
    %354 = vector.broadcast %cst_98 : f32 to vector<2x32xf32>
    %355 = arith.addf %354, %353 : vector<2x32xf32>
    %356 = arith.divf %354, %355 : vector<2x32xf32>
    %357 = vector.extract_strided_slice %219 {offsets = [0, 3, 0], sizes = [2, 1, 32], strides = [1, 1, 1]} : vector<2x8x32xf32> to vector<2x1x32xf32>
    %358 = vector.shape_cast %357 : vector<2x1x32xf32> to vector<2x32xf32>
    %359 = arith.mulf %356, %358 : vector<2x32xf32>
    %360 = arith.truncf %359 : vector<2x32xf32> to vector<2x32xbf16>
    %cst_99 = arith.constant dense<0.000000e+00> : vector<2x128xf32>
    %361 = tpu.matmul %360, %237, %cst_99 {dimension_numbers = #tpu.dot_dimension_numbers<[1], [0], [0], [1], [0, 0, 1, 1], [], []>} : vector<2x32xbf16>, vector<32x128xbf16>, vector<2x128xf32> -> vector<2x128xf32>
    %362 = vector.extract_strided_slice %347 {offsets = [0, 0], sizes = [2, 128], strides = [1, 1]} : vector<2x160xf32> to vector<2x128xf32>
    %363 = arith.addf %361, %362 : vector<2x128xf32>
    %364 = vector.broadcast %238 : vector<1x128xf32> to vector<2x128xf32>
    %365 = arith.addf %363, %364 : vector<2x128xf32>
    %366 = arith.negf %365 : vector<2x128xf32>
    %367 = math.exp %366 : vector<2x128xf32>
    %cst_100 = arith.constant 1.000000e+00 : f32
    %368 = vector.broadcast %cst_100 : f32 to vector<2x128xf32>
    %369 = arith.addf %368, %367 : vector<2x128xf32>
    %370 = arith.divf %368, %369 : vector<2x128xf32>
    %371 = math.tanh %365 : vector<2x128xf32>
    %372 = vector.extract_strided_slice %370 {offsets = [0, 0], sizes = [2, 32], strides = [1, 1]} : vector<2x128xf32> to vector<2x32xf32>
    %373 = vector.extract_strided_slice %370 {offsets = [0, 32], sizes = [2, 32], strides = [1, 1]} : vector<2x128xf32> to vector<2x32xf32>
    %374 = vector.extract_strided_slice %371 {offsets = [0, 64], sizes = [2, 32], strides = [1, 1]} : vector<2x128xf32> to vector<2x32xf32>
    %375 = vector.extract_strided_slice %370 {offsets = [0, 96], sizes = [2, 32], strides = [1, 1]} : vector<2x128xf32> to vector<2x32xf32>
    %376 = arith.mulf %373, %343 : vector<2x32xf32>
    %377 = arith.mulf %372, %374 : vector<2x32xf32>
    %378 = arith.addf %376, %377 : vector<2x32xf32>
    %379 = math.tanh %378 : vector<2x32xf32>
    %380 = arith.mulf %375, %379 : vector<2x32xf32>
    %381 = arith.truncf %380 : vector<2x32xf32> to vector<2x32xbf16>
    %cst_101 = arith.constant dense<0.000000e+00> : vector<2x160xf32>
    %382 = tpu.matmul %381, %235, %cst_101 {dimension_numbers = #tpu.dot_dimension_numbers<[1], [0], [0], [1], [0, 0, 1, 1], [], []>} : vector<2x32xbf16>, vector<32x160xbf16>, vector<2x160xf32> -> vector<2x160xf32>
    %383 = vector.extract_strided_slice %382 {offsets = [0, 128], sizes = [2, 32], strides = [1, 1]} : vector<2x160xf32> to vector<2x32xf32>
    %384 = vector.extract_strided_slice %233 {offsets = [0, 4, 0], sizes = [2, 1, 32], strides = [1, 1, 1]} : vector<2x8x32xf32> to vector<2x1x32xf32>
    %385 = vector.shape_cast %384 : vector<2x1x32xf32> to vector<2x32xf32>
    %386 = arith.addf %383, %385 : vector<2x32xf32>
    %387 = arith.negf %386 : vector<2x32xf32>
    %388 = math.exp %387 : vector<2x32xf32>
    %cst_102 = arith.constant 1.000000e+00 : f32
    %389 = vector.broadcast %cst_102 : f32 to vector<2x32xf32>
    %390 = arith.addf %389, %388 : vector<2x32xf32>
    %391 = arith.divf %389, %390 : vector<2x32xf32>
    %392 = vector.extract_strided_slice %219 {offsets = [0, 4, 0], sizes = [2, 1, 32], strides = [1, 1, 1]} : vector<2x8x32xf32> to vector<2x1x32xf32>
    %393 = vector.shape_cast %392 : vector<2x1x32xf32> to vector<2x32xf32>
    %394 = arith.mulf %391, %393 : vector<2x32xf32>
    %395 = arith.truncf %394 : vector<2x32xf32> to vector<2x32xbf16>
    %cst_103 = arith.constant dense<0.000000e+00> : vector<2x128xf32>
    %396 = tpu.matmul %395, %237, %cst_103 {dimension_numbers = #tpu.dot_dimension_numbers<[1], [0], [0], [1], [0, 0, 1, 1], [], []>} : vector<2x32xbf16>, vector<32x128xbf16>, vector<2x128xf32> -> vector<2x128xf32>
    %397 = vector.extract_strided_slice %382 {offsets = [0, 0], sizes = [2, 128], strides = [1, 1]} : vector<2x160xf32> to vector<2x128xf32>
    %398 = arith.addf %396, %397 : vector<2x128xf32>
    %399 = vector.broadcast %238 : vector<1x128xf32> to vector<2x128xf32>
    %400 = arith.addf %398, %399 : vector<2x128xf32>
    %401 = arith.negf %400 : vector<2x128xf32>
    %402 = math.exp %401 : vector<2x128xf32>
    %cst_104 = arith.constant 1.000000e+00 : f32
    %403 = vector.broadcast %cst_104 : f32 to vector<2x128xf32>
    %404 = arith.addf %403, %402 : vector<2x128xf32>
    %405 = arith.divf %403, %404 : vector<2x128xf32>
    %406 = math.tanh %400 : vector<2x128xf32>
    %407 = vector.extract_strided_slice %405 {offsets = [0, 0], sizes = [2, 32], strides = [1, 1]} : vector<2x128xf32> to vector<2x32xf32>
    %408 = vector.extract_strided_slice %405 {offsets = [0, 32], sizes = [2, 32], strides = [1, 1]} : vector<2x128xf32> to vector<2x32xf32>
    %409 = vector.extract_strided_slice %406 {offsets = [0, 64], sizes = [2, 32], strides = [1, 1]} : vector<2x128xf32> to vector<2x32xf32>
    %410 = vector.extract_strided_slice %405 {offsets = [0, 96], sizes = [2, 32], strides = [1, 1]} : vector<2x128xf32> to vector<2x32xf32>
    %411 = arith.mulf %408, %378 : vector<2x32xf32>
    %412 = arith.mulf %407, %409 : vector<2x32xf32>
    %413 = arith.addf %411, %412 : vector<2x32xf32>
    %414 = math.tanh %413 : vector<2x32xf32>
    %415 = arith.mulf %410, %414 : vector<2x32xf32>
    %416 = arith.truncf %415 : vector<2x32xf32> to vector<2x32xbf16>
    %cst_105 = arith.constant dense<0.000000e+00> : vector<2x160xf32>
    %417 = tpu.matmul %416, %235, %cst_105 {dimension_numbers = #tpu.dot_dimension_numbers<[1], [0], [0], [1], [0, 0, 1, 1], [], []>} : vector<2x32xbf16>, vector<32x160xbf16>, vector<2x160xf32> -> vector<2x160xf32>
    %418 = vector.extract_strided_slice %417 {offsets = [0, 128], sizes = [2, 32], strides = [1, 1]} : vector<2x160xf32> to vector<2x32xf32>
    %419 = vector.extract_strided_slice %233 {offsets = [0, 5, 0], sizes = [2, 1, 32], strides = [1, 1, 1]} : vector<2x8x32xf32> to vector<2x1x32xf32>
    %420 = vector.shape_cast %419 : vector<2x1x32xf32> to vector<2x32xf32>
    %421 = arith.addf %418, %420 : vector<2x32xf32>
    %422 = arith.negf %421 : vector<2x32xf32>
    %423 = math.exp %422 : vector<2x32xf32>
    %cst_106 = arith.constant 1.000000e+00 : f32
    %424 = vector.broadcast %cst_106 : f32 to vector<2x32xf32>
    %425 = arith.addf %424, %423 : vector<2x32xf32>
    %426 = arith.divf %424, %425 : vector<2x32xf32>
    %427 = vector.extract_strided_slice %219 {offsets = [0, 5, 0], sizes = [2, 1, 32], strides = [1, 1, 1]} : vector<2x8x32xf32> to vector<2x1x32xf32>
    %428 = vector.shape_cast %427 : vector<2x1x32xf32> to vector<2x32xf32>
    %429 = arith.mulf %426, %428 : vector<2x32xf32>
    %430 = arith.truncf %429 : vector<2x32xf32> to vector<2x32xbf16>
    %cst_107 = arith.constant dense<0.000000e+00> : vector<2x128xf32>
    %431 = tpu.matmul %430, %237, %cst_107 {dimension_numbers = #tpu.dot_dimension_numbers<[1], [0], [0], [1], [0, 0, 1, 1], [], []>} : vector<2x32xbf16>, vector<32x128xbf16>, vector<2x128xf32> -> vector<2x128xf32>
    %432 = vector.extract_strided_slice %417 {offsets = [0, 0], sizes = [2, 128], strides = [1, 1]} : vector<2x160xf32> to vector<2x128xf32>
    %433 = arith.addf %431, %432 : vector<2x128xf32>
    %434 = vector.broadcast %238 : vector<1x128xf32> to vector<2x128xf32>
    %435 = arith.addf %433, %434 : vector<2x128xf32>
    %436 = arith.negf %435 : vector<2x128xf32>
    %437 = math.exp %436 : vector<2x128xf32>
    %cst_108 = arith.constant 1.000000e+00 : f32
    %438 = vector.broadcast %cst_108 : f32 to vector<2x128xf32>
    %439 = arith.addf %438, %437 : vector<2x128xf32>
    %440 = arith.divf %438, %439 : vector<2x128xf32>
    %441 = math.tanh %435 : vector<2x128xf32>
    %442 = vector.extract_strided_slice %440 {offsets = [0, 0], sizes = [2, 32], strides = [1, 1]} : vector<2x128xf32> to vector<2x32xf32>
    %443 = vector.extract_strided_slice %440 {offsets = [0, 32], sizes = [2, 32], strides = [1, 1]} : vector<2x128xf32> to vector<2x32xf32>
    %444 = vector.extract_strided_slice %441 {offsets = [0, 64], sizes = [2, 32], strides = [1, 1]} : vector<2x128xf32> to vector<2x32xf32>
    %445 = vector.extract_strided_slice %440 {offsets = [0, 96], sizes = [2, 32], strides = [1, 1]} : vector<2x128xf32> to vector<2x32xf32>
    %446 = arith.mulf %443, %413 : vector<2x32xf32>
    %447 = arith.mulf %442, %444 : vector<2x32xf32>
    %448 = arith.addf %446, %447 : vector<2x32xf32>
    %449 = math.tanh %448 : vector<2x32xf32>
    %450 = arith.mulf %445, %449 : vector<2x32xf32>
    %451 = arith.truncf %450 : vector<2x32xf32> to vector<2x32xbf16>
    %cst_109 = arith.constant dense<0.000000e+00> : vector<2x160xf32>
    %452 = tpu.matmul %451, %235, %cst_109 {dimension_numbers = #tpu.dot_dimension_numbers<[1], [0], [0], [1], [0, 0, 1, 1], [], []>} : vector<2x32xbf16>, vector<32x160xbf16>, vector<2x160xf32> -> vector<2x160xf32>
    %453 = vector.extract_strided_slice %452 {offsets = [0, 128], sizes = [2, 32], strides = [1, 1]} : vector<2x160xf32> to vector<2x32xf32>
    %454 = vector.extract_strided_slice %233 {offsets = [0, 6, 0], sizes = [2, 1, 32], strides = [1, 1, 1]} : vector<2x8x32xf32> to vector<2x1x32xf32>
    %455 = vector.shape_cast %454 : vector<2x1x32xf32> to vector<2x32xf32>
    %456 = arith.addf %453, %455 : vector<2x32xf32>
    %457 = arith.negf %456 : vector<2x32xf32>
    %458 = math.exp %457 : vector<2x32xf32>
    %cst_110 = arith.constant 1.000000e+00 : f32
    %459 = vector.broadcast %cst_110 : f32 to vector<2x32xf32>
    %460 = arith.addf %459, %458 : vector<2x32xf32>
    %461 = arith.divf %459, %460 : vector<2x32xf32>
    %462 = vector.extract_strided_slice %219 {offsets = [0, 6, 0], sizes = [2, 1, 32], strides = [1, 1, 1]} : vector<2x8x32xf32> to vector<2x1x32xf32>
    %463 = vector.shape_cast %462 : vector<2x1x32xf32> to vector<2x32xf32>
    %464 = arith.mulf %461, %463 : vector<2x32xf32>
    %465 = arith.truncf %464 : vector<2x32xf32> to vector<2x32xbf16>
    %cst_111 = arith.constant dense<0.000000e+00> : vector<2x128xf32>
    %466 = tpu.matmul %465, %237, %cst_111 {dimension_numbers = #tpu.dot_dimension_numbers<[1], [0], [0], [1], [0, 0, 1, 1], [], []>} : vector<2x32xbf16>, vector<32x128xbf16>, vector<2x128xf32> -> vector<2x128xf32>
    %467 = vector.extract_strided_slice %452 {offsets = [0, 0], sizes = [2, 128], strides = [1, 1]} : vector<2x160xf32> to vector<2x128xf32>
    %468 = arith.addf %466, %467 : vector<2x128xf32>
    %469 = vector.broadcast %238 : vector<1x128xf32> to vector<2x128xf32>
    %470 = arith.addf %468, %469 : vector<2x128xf32>
    %471 = arith.negf %470 : vector<2x128xf32>
    %472 = math.exp %471 : vector<2x128xf32>
    %cst_112 = arith.constant 1.000000e+00 : f32
    %473 = vector.broadcast %cst_112 : f32 to vector<2x128xf32>
    %474 = arith.addf %473, %472 : vector<2x128xf32>
    %475 = arith.divf %473, %474 : vector<2x128xf32>
    %476 = math.tanh %470 : vector<2x128xf32>
    %477 = vector.extract_strided_slice %475 {offsets = [0, 0], sizes = [2, 32], strides = [1, 1]} : vector<2x128xf32> to vector<2x32xf32>
    %478 = vector.extract_strided_slice %475 {offsets = [0, 32], sizes = [2, 32], strides = [1, 1]} : vector<2x128xf32> to vector<2x32xf32>
    %479 = vector.extract_strided_slice %476 {offsets = [0, 64], sizes = [2, 32], strides = [1, 1]} : vector<2x128xf32> to vector<2x32xf32>
    %480 = vector.extract_strided_slice %475 {offsets = [0, 96], sizes = [2, 32], strides = [1, 1]} : vector<2x128xf32> to vector<2x32xf32>
    %481 = arith.mulf %478, %448 : vector<2x32xf32>
    %482 = arith.mulf %477, %479 : vector<2x32xf32>
    %483 = arith.addf %481, %482 : vector<2x32xf32>
    %484 = math.tanh %483 : vector<2x32xf32>
    %485 = arith.mulf %480, %484 : vector<2x32xf32>
    %486 = arith.truncf %485 : vector<2x32xf32> to vector<2x32xbf16>
    %cst_113 = arith.constant dense<0.000000e+00> : vector<2x160xf32>
    %487 = tpu.matmul %486, %235, %cst_113 {dimension_numbers = #tpu.dot_dimension_numbers<[1], [0], [0], [1], [0, 0, 1, 1], [], []>} : vector<2x32xbf16>, vector<32x160xbf16>, vector<2x160xf32> -> vector<2x160xf32>
    %488 = vector.extract_strided_slice %487 {offsets = [0, 128], sizes = [2, 32], strides = [1, 1]} : vector<2x160xf32> to vector<2x32xf32>
    %489 = vector.extract_strided_slice %233 {offsets = [0, 7, 0], sizes = [2, 1, 32], strides = [1, 1, 1]} : vector<2x8x32xf32> to vector<2x1x32xf32>
    %490 = vector.shape_cast %489 : vector<2x1x32xf32> to vector<2x32xf32>
    %491 = arith.addf %488, %490 : vector<2x32xf32>
    %492 = arith.negf %491 : vector<2x32xf32>
    %493 = math.exp %492 : vector<2x32xf32>
    %cst_114 = arith.constant 1.000000e+00 : f32
    %494 = vector.broadcast %cst_114 : f32 to vector<2x32xf32>
    %495 = arith.addf %494, %493 : vector<2x32xf32>
    %496 = arith.divf %494, %495 : vector<2x32xf32>
    %497 = vector.extract_strided_slice %219 {offsets = [0, 7, 0], sizes = [2, 1, 32], strides = [1, 1, 1]} : vector<2x8x32xf32> to vector<2x1x32xf32>
    %498 = vector.shape_cast %497 : vector<2x1x32xf32> to vector<2x32xf32>
    %499 = arith.mulf %496, %498 : vector<2x32xf32>
    %500 = arith.truncf %499 : vector<2x32xf32> to vector<2x32xbf16>
    %cst_115 = arith.constant dense<0.000000e+00> : vector<2x128xf32>
    %501 = tpu.matmul %500, %237, %cst_115 {dimension_numbers = #tpu.dot_dimension_numbers<[1], [0], [0], [1], [0, 0, 1, 1], [], []>} : vector<2x32xbf16>, vector<32x128xbf16>, vector<2x128xf32> -> vector<2x128xf32>
    %502 = vector.extract_strided_slice %487 {offsets = [0, 0], sizes = [2, 128], strides = [1, 1]} : vector<2x160xf32> to vector<2x128xf32>
    %503 = arith.addf %501, %502 : vector<2x128xf32>
    %504 = vector.broadcast %238 : vector<1x128xf32> to vector<2x128xf32>
    %505 = arith.addf %503, %504 : vector<2x128xf32>
    %506 = arith.negf %505 : vector<2x128xf32>
    %507 = math.exp %506 : vector<2x128xf32>
    %cst_116 = arith.constant 1.000000e+00 : f32
    %508 = vector.broadcast %cst_116 : f32 to vector<2x128xf32>
    %509 = arith.addf %508, %507 : vector<2x128xf32>
    %510 = arith.divf %508, %509 : vector<2x128xf32>
    %511 = math.tanh %505 : vector<2x128xf32>
    %512 = vector.extract_strided_slice %510 {offsets = [0, 0], sizes = [2, 32], strides = [1, 1]} : vector<2x128xf32> to vector<2x32xf32>
    %513 = vector.extract_strided_slice %510 {offsets = [0, 32], sizes = [2, 32], strides = [1, 1]} : vector<2x128xf32> to vector<2x32xf32>
    %514 = vector.extract_strided_slice %511 {offsets = [0, 64], sizes = [2, 32], strides = [1, 1]} : vector<2x128xf32> to vector<2x32xf32>
    %515 = vector.extract_strided_slice %510 {offsets = [0, 96], sizes = [2, 32], strides = [1, 1]} : vector<2x128xf32> to vector<2x32xf32>
    %516 = arith.mulf %513, %483 : vector<2x32xf32>
    %517 = arith.mulf %512, %514 : vector<2x32xf32>
    %518 = arith.addf %516, %517 : vector<2x32xf32>
    %519 = math.tanh %518 : vector<2x32xf32>
    %520 = arith.mulf %515, %519 : vector<2x32xf32>
    %c0_117 = arith.constant 0 : index
    %c0_118 = arith.constant 0 : index
    %521 = vector.load %arg14[%c0_117, %c0_118] : memref<32x4xf32, #tpu.memory_space<vmem>>, vector<32x4xf32>
    %cst_119 = arith.constant dense<0.000000e+00> : vector<2x4xf32>
    %522 = tpu.matmul %520, %521, %cst_119 {dimension_numbers = #tpu.dot_dimension_numbers<[1], [0], [0], [1], [0, 0, 1, 1], [], []>} : vector<2x32xf32>, vector<32x4xf32>, vector<2x4xf32> -> vector<2x4xf32>
    %c0_120 = arith.constant 0 : index
    %c0_121 = arith.constant 0 : index
    %523 = vector.load %arg15[%c0_120, %c0_121] : memref<1x4xf32, #tpu.memory_space<vmem>>, vector<1x4xf32>
    %524 = vector.broadcast %523 : vector<1x4xf32> to vector<2x4xf32>
    %525 = arith.addf %522, %524 : vector<2x4xf32>
    %c0_122 = arith.constant 0 : index
    %c0_123 = arith.constant 0 : index
    %526 = vector.load %arg16[%c0_122, %c0_123] : memref<2x4xf32, #tpu.memory_space<vmem>>, vector<2x4xf32>
    tpu.vector_store %arg16[%c0_122, %c0_123], %525 {strides = array<i32>} : memref<2x4xf32, #tpu.memory_space<vmem>>, vector<2x4xf32>,
    return
  }
}

</mosaic_0001>

<bundles_post_ra>
// kernel: model_forward.1
= control target key start
LH: loop header
LB: loop body
LE: loop exit
PB: predicated region body
PF: predicated region fallthrough
CT: control target
= control target key end

     0   :  { %s3519_s0 = inlined_call_operand.vmem [shape: f32[2], index: 0, kind: input, shape index: {}]   ;;  %s3520_s1 = inlined_call_operand.vmem [shape: f32[2,8,8], index: 1, kind: input, shape index: {}]   ;;  %s3521_s2 = inlined_call_operand.vmem [shape: f32[24,8], index: 2, kind: input, shape index: {}]   ;;  %s3522_s3 = inlined_call_operand.vmem [shape: f32[1,8], index: 3, kind: input, shape index: {}]   ;;  %s3523_s4 = inlined_call_operand.vmem [shape: f32[24,16], index: 4, kind: input, shape index: {}]   ;;  %s3524_s5 = inlined_call_operand.vmem [shape: f32[1,16], index: 5, kind: input, shape index: {}]   ;;  %s3525_s6 = inlined_call_operand.vmem [shape: f32[48,32], index: 6, kind: input, shape index: {}]   ;;  %s3526_s7 = inlined_call_operand.vmem [shape: f32[1,32], index: 7, kind: input, shape index: {}]   ;;  %s3527_s8 = inlined_call_operand.vmem [shape: f32[1,1,32], index: 8, kind: input, shape index: {}]   ;;  %s3528_s9 = inlined_call_operand.vmem [shape: f32[1,1,32], index: 9, kind: input, shape index: {}]   ;;  %s3529_s10 = inlined_call_operand.vmem [shape: f32[1,1,32], index: 10, kind: input, shape index: {}]   ;;  %s3530_s11 = inlined_call_operand.vmem [shape: f32[32,160], index: 11, kind: input, shape index: {}]   ;;  %s3531_s12 = inlined_call_operand.vmem [shape: f32[32,128], index: 12, kind: input, shape index: {}]   ;;  %s3532_s13 = inlined_call_operand.vmem [shape: f32[1,128], index: 13, kind: input, shape index: {}]   ;;  %s3533_s14 = inlined_call_operand.vmem [shape: f32[32,4], index: 14, kind: input, shape index: {}]   ;;  %s3534_s15 = inlined_call_operand.vmem [shape: f32[1,4], index: 15, kind: input, shape index: {}]   ;;  %s3535_s16 = inlined_call_operand.hbm [shape: f32[2,4], index: 16, kind: output, shape index: {}]  }
   0x1   :  { %3536 = sst [smem:[#allocation8_spill]] %s3519_s0 }
   0x2   :  { %21 = vsyncpa [#allocation4], 0 }
   0x3   :  { %22 = vsyncpa [#allocation3], 0  ;;  %s3537_s23 = sld [smem:[#allocation8_spill]] }
   0x9   :  { %s29_s24 = sshll.u32 %s3537_s23, 4  ;;  %s30_s24 = int_to_ptr.vmem [resolvable:$true] %s29_s24 }
   0xa   :  { %s2898_s25 = scalar_lea.vmem %s30_s24, 16  ;;  %p2903_p1 = scmp.lt.s32.totalorder %s30_s24, %s30_s24 }
   0xb   :  { %p2899_p0 = scmp.ne.s32.totalorder %s30_s24, %s2898_s25  ;;  %p2904_p2 = scmp.lt.s32.totalorder %s2898_s25, %s2898_s25 }
   0xd   :  { %p2905_p3 = por %p2904_p2, %p2903_p1 }
   0xf   :  { %p2906_p4 = pnand %p2905_p3, %p2899_p0 }
  0x11   :  { %2909 = shalt.err (!%p2906_p4)
}
  0x12   :  { %s2936_s26 = smov [#allocation2]  }
  0x13   :  { %32 = dma.vmem_to_smem %s30_s24, 16, %s2936_s26, [#allocation4]  }
  0x14   :  { %2932 = dma.done.wait [#allocation4], 16  }
  0x15   :  { %2933 = vsyncadd [#allocation4], 4294967280 }
  0x16   :  { %66 = sfence }
  0x17   :  { %s70_s27 = sld [smem:[#allocation2]]  ;;  %v3038_v0 = vld [vmem:[%s3520_s1] sm:$0xff]  ;;  %v3043_v1 = vld [vmem:[%s3520_s1 + $0x8] sm:$0xff]  ;;  %s2937_s17 = smov 126   ;;  %vm107_vm0 = vcmask 31768   ;;  %vm274_vm1 = vcmask 64512  }
  0x18   :  { %s2467_s18 = sld [smem:[#allocation2 + $0x1]]  ;;  %v77_v8 = vadd.f32 1e-06, %v3038_v0  ;;  %v78_v11 = vadd.f32 1e-06, %v3043_v1  ;;  %v272_v59 = vld [vmem:[%s3521_s2 + $0x8] sm:$0xff]  ;;  %2593 = vmatprep.mubr.msk.f32.mxu0 %vm274_vm1, %v3038_v0 }
  0x19   :  { %2591 = vmatprep.subr.mxu0 %v272_v59  ;;  %s2938_s20 = smov 125   ;;  %vm261_vm2 = vcmask 1040384   ;;  %vm268_vm3 = vcmask 1046528   ;;  %vm202_vm4 = vcmask 1041409   ;;  %vm205_vm5 = vcmask 58368  }
  0x1a   :  { %2592 = vmatpush3.msra.mxu0 %v272_v59  ;;  %vm858_vm6 = vcmask 130048   ;;  %vm2942_vm7 = vmmov 0   ;;  %vm1189_vm8 = vcmask 261120   ;;  %vm2450_vm9 = vcmask 25600  }
  0x1b   :  { %2594 = vmatmul.mubr.msk.f32.vlgmr.msra.gmra.mrb[0].mxu0 %vm274_vm1, %v3043_v1 }
  0x1d   :  { %v72_v2 = vstv %s70_s27 }
  0x1e   :  { %v73_v3 = vmul.f32 %v72_v2, %v3038_v0  ;;  %v74_v4 = vmul.f32 %v72_v2, %v3043_v1  ;;  %v79_v7 = vstv %s2467_s18 }
  0x1f   :  { %2768 = vrcp.f32 %v79_v7 }
  0x20   :  { %v75_v5 = vadd.f32 1e-06, %v73_v3  ;;  %v76_v6 = vadd.f32 1e-06, %v74_v4 }
  0x22   :  { %85 = vrot.lane.b32.xlu0 %v75_v5, %s2937_s17 }
  0x26   :  { %87 = vrot.lane.b32.xlu0 %v76_v6, %s2937_s17 }
  0x29   :  { %v2769_v9 = vpop.eup %2768 }
  0x2a   :  { %v81_v10 = vmul.f32 %v2769_v9, %v77_v8  ;;  %v82_v14 = vmul.f32 %v2769_v9, %v78_v11  ;;  %v257_v8 = vrot.slane %v3038_v0, 7  ;;  %v271_v9 = vld [vmem:[%s3521_s2] sm:$0xff] }
  0x2b   :  { %2596 = vmatprep.subr.mxu0 %v271_v9 }
  0x2c   :  { %v262_v11 = vsel %vm261_vm2, 0.0, %v257_v8  ;;  %2597 = vmatpush3.msra.mxu0 %v271_v9 }
  0x2d   :  { %2598 = vmatprep.mubr.msk.f32.mxu0 %vm274_vm1, %v262_v11 }
  0x94   :  { %v86_v12 = vpop.permute.xlu0 %85 }
  0x95   :  { %v91_v13 = vmul.f32 %v86_v12, %v81_v10 }
  0x97   :  { %v93_v15 = vmin.f32 %v91_v13, 0.99  ;;  %v264_v13 = vrot.slane %v3038_v0, 1 }
  0x98   :  { %v88_v16 = vpop.permute.xlu0 %87 }
  0x99   :  { %v95_v17 = vsub.f32 1.0, %v93_v15  ;;  %v92_v18 = vmul.f32 %v88_v16, %v82_v14 }
  0x9b   :  { %v97_v19 = vadd.f32 1e-06, %v95_v17  ;;  %v94_v20 = vmin.f32 %v92_v18, 0.99  ;;  %v2939_v17 = vmov 3  }
  0x9c   :  { %2767 = vset.pattern.permute.xlu1 %v2939_v17  ;;  %2766 = vset.pattern.permute.xlu0 %v2939_v17 }
  0x9d   :  { %2770 = vrcp.f32 %v97_v19  ;;  %v96_v21 = vsub.f32 1.0, %v94_v20 }
  0x9f   :  { %v98_v22 = vadd.f32 1e-06, %v96_v21 }
  0xa1   :  { %2772 = vrcp.f32 %v98_v22 }
  0xa7   :  { %v2771_v23 = vpop.eup %2770 }
  0xa8   :  { %v100_v24 = vmul.f32 %v2771_v23, %v93_v15  ;;  %v265_v15 = vrot.slane %v3043_v1, 1 }
  0xaa   :  { %v103_v25 = vmul.f32 %v100_v24, %v86_v12  ;;  %v270_v18 = vsel %vm268_vm3, %v265_v15, 0.0 }
  0xab   :  { %v2773_v26 = vpop.eup %2772 }
  0xac   :  { %v3049_v27 = vmul.f32 0.5, %v103_v25  ;;  %v102_v28 = vmul.f32 %v2773_v26, %v94_v20 }
  0xae   :  { %v104_v29 = vmul.f32 %v102_v28, %v88_v16  ;;  %v3052_v30 = vmul.f32 %v3049_v27, %v81_v10  ;;  %v125_v32 = vsel %vm107_vm0, %v3049_v27, -inf  ;;  %v108_v35 = vsel %vm107_vm0, %v3049_v27, inf }
  0xaf   :  { %v258_v10 = vrot.slane %v3043_v1, 7  ;;  %v269_v16 = vsel %vm268_vm3, %v264_v13, 0.0 }
  0xb0   :  { %v3054_v31 = vmul.f32 0.5, %v104_v29  ;;  %v147_v39 = vsel %vm107_vm0, %v3052_v30, inf  ;;  %v164_v40 = vsel %vm107_vm0, %v3052_v30, -inf }
  0xb1   :  { %v263_v12 = vsel %vm261_vm2, 0.0, %v258_v10 }
  0xb2   :  { %v126_v33 = vsel %vm107_vm0, %v3054_v31, -inf  ;;  %v3059_v34 = vmul.f32 %v3054_v31, %v82_v14  ;;  %v109_v36 = vsel %vm107_vm0, %v3054_v31, inf  ;;  %2599 = vmatmul.mubr.msk.f32.vlgmr.msra.gmra.mrb[0].mxu0 %vm274_vm1, %v263_v12  ;;  %v273_v14 = vld [vmem:[%s3521_s2 + $0x10] sm:$0xff] }
  0xb3   :  { %v110_v37 = vmin.f32 %v108_v35, %v109_v36  ;;  %v127_v38 = vmax.f32 %v125_v32, %v126_v33  ;;  %2601 = vmatprep.subr.mxu0 %v273_v14  ;;  %2603 = vmatprep.mubr.msk.f32.mxu0 %vm274_vm1, %v269_v16 }
  0xb4   :  { %v148_v41 = vsel %vm107_vm0, %v3059_v34, inf  ;;  %v165_v42 = vsel %vm107_vm0, %v3059_v34, -inf  ;;  %2602 = vmatpush3.msra.mxu0 %v273_v14 }
  0xb5   :  { %v111_v43 = vrot.slane %v110_v37, 4  ;;  %v149_v44 = vmin.f32 %v147_v39, %v148_v41  ;;  %v128_v45 = vrot.slane %v127_v38, 4  ;;  %v166_v46 = vmax.f32 %v164_v40, %v165_v42 }
  0xb7   :  { %v112_v47 = vmin.f32 %v110_v37, %v111_v43  ;;  %v150_v48 = vrot.slane %v149_v44, 4  ;;  %v129_v49 = vmax.f32 %v127_v38, %v128_v45  ;;  %v167_v50 = vrot.slane %v166_v46, 4 }
  0xb9   :  { %v113_v51 = vrot.slane %v112_v47, 2  ;;  %v151_v52 = vmin.f32 %v149_v44, %v150_v48  ;;  %v130_v53 = vrot.slane %v129_v49, 2  ;;  %v168_v54 = vmax.f32 %v166_v46, %v167_v50  ;;  %v2496_v46 = vld [vmem:[%s3528_s9] ss:$0 sm:$0xff] }
  0xba   :  { %2604 = vmatmul.mubr.msk.f32.vlgmr.msra.gmra.mrb[0].mxu0 %vm274_vm1, %v270_v18 }
  0xbb   :  { %v114_v55 = vmin.f32 %v112_v47, %v113_v51  ;;  %v152_v56 = vrot.slane %v151_v52, 2  ;;  %v131_v57 = vmax.f32 %v129_v49, %v130_v53  ;;  %v169_v58 = vrot.slane %v168_v54, 2 }
  0xbd   :  { %v115_v60 = vrot.slane %v114_v55, 1  ;;  %v153_v61 = vmin.f32 %v151_v52, %v152_v56  ;;  %v132_v2 = vrot.slane %v131_v57, 1  ;;  %v170_v3 = vmax.f32 %v168_v54, %v169_v58 }
  0xbf   :  { %v116_v62 = vmin.f32 %v114_v55, %v115_v60  ;;  %v154_v63 = vrot.slane %v153_v61, 1  ;;  %v133_v5 = vmax.f32 %v131_v57, %v132_v2  ;;  %v171_v6 = vrot.slane %v170_v3, 1  ;;  %v2497_v57 = vld [vmem:[%s3529_s10] ss:$0 sm:$0xff]  ;;  %s2943_s10 = smov 64  }
  0xc1   :  { %118 = vrot.lane.b32.xlu1 %v116_v62, %s2938_s20  ;;  %v155_v4 = vmin.f32 %v153_v61, %v154_v63  ;;  %v172_v7 = vmax.f32 %v170_v3, %v171_v6 }
  0xc3   :  { %157 = vrot.lane.b32.xlu0 %v155_v4, %s2938_s20 }
  0xc5   :  { %135 = vrot.lane.b32.xlu1 %v133_v5, %s2938_s20 }
  0xc9   :  { %174 = vrot.lane.b32.xlu1 %v172_v7, %s2938_s20 }
 0x133   :  { %v119_v0 = vpop.permute.xlu1 %118 }
 0x134   :  { %2747 = vpush %v119_v0 }
 0x135   :  { %v158_v20 = vpop.permute.xlu0 %157 }
 0x137   :  { %v136_v19 = vpop.permute.xlu1 %135 }
 0x138   :  { %2749 = vpush %v136_v19 }
 0x139   :  { %2751 = vpush %v158_v20 }
 0x13b   :  { %v175_v1 = vpop.permute.xlu1 %174 }
 0x13c   :  { %2753 = vpush %v175_v1 }
 0x165   :  { %s2748_s2 = spop %2747 }
 0x166   :  { %v122_v23 = vstv %s2748_s2 }
 0x167   :  { %v123_v24 = vsub.f32 %v3049_v27, %v122_v23  ;;  %v124_v25 = vsub.f32 %v3054_v31, %v122_v23  ;;  %v192_v27 = vlaneseq  ;;  %v3142_v23 = vld [vmem:[%s3523_s4] sm:$0xff] }
 0x169   :  { %s2750_s25 = spop %2749  ;;  %v193_v41 = vand.u32 127, %v192_v27  ;;  %v3096_v31 = vshrl.u32 %v192_v27, 7 }
 0x16a   :  { %s139_s26 = ssub.f32 %s2750_s25, %s2748_s2  ;;  %s2752_s28 = spop %2751 }
 0x16b   :  { %v161_v28 = vstv %s2752_s28  ;;  %v196_v42 = vsub.s32 %v193_v41, %v3096_v31 }
 0x16c   :  { %s140_s27 = sadd.f32 1e-06, %s139_s26  ;;  %v162_v33 = vsub.f32 %v3052_v30, %v161_v28  ;;  %v163_v35 = vsub.f32 %v3059_v34, %v161_v28  ;;  %v2495_v30 = vld [vmem:[%s3527_s8] ss:$0 sm:$0xff] }
 0x16d   :  { %s2754_s29 = spop %2753 }
 0x16e   :  { %v141_v21 = vstv %s140_s27  ;;  %s178_s30 = ssub.f32 %s2754_s29, %s2752_s28 }
 0x16f   :  { %2774 = vrcp.f32 %v141_v21 }
 0x170   :  { %s179_s0 = sadd.f32 1e-06, %s178_s30 }
 0x172   :  { %v180_v22 = vstv %s179_s0 }
 0x173   :  { %2776 = vrcp.f32 %v180_v22  ;;  %v602_v22 = vld [vmem:[%s3523_s4 + $0x8] sm:$0xff] }
 0x174   :  { %2606 = vmatprep.subr.mxu1 %v602_v22 }
 0x175   :  { %2607 = vmatpush3.msra.mxu1 %v602_v22 }
 0x176   :  { %2611 = vmatprep.subr.mxu1 %v3142_v23 }
 0x179   :  { %v2775_v26 = vpop.eup %2774 }
 0x17a   :  { %v144_v29 = vmul.f32 %v2775_v26, %v124_v25  ;;  %v143_v32 = vmul.f32 %v2775_v26, %v123_v24  ;;  %v2474_v24 = vld [vmem:[%s3522_s3] ss:$0 sm:$0xff] }
 0x17c   :  { %190 = vperm.xlu1 %2767, %v144_v29   ;;  %187 = vperm.xlu0 %2766, %v143_v32  }
 0x17d   :  { %v2777_v36 = vpop.eup %2776 }
 0x17e   :  { %v183_v37 = vmul.f32 %v2777_v36, %v163_v35  ;;  %v182_v38 = vmul.f32 %v2777_v36, %v162_v33 }
 0x180   :  { %228 = vperm.xlu0 %2766, %v183_v37   ;;  %225 = vperm.xlu1 %2767, %v182_v38  }
 0x18d   :  { %v2605_v39 = vpop.f32.mrb[0].mxu0 }
 0x18e   :  { %v507_v40 = vpop.f32.mrb[1].mxu0  ;;  %v526_v25 = vadd.f32 %v2605_v39, %v2474_v24 }
 0x18f   :  { %v525_v26 = vadd.f32 %v2474_v24, %v507_v40 }
 0x190   :  { %v3148_v28 = vmax.f32 %v526_v25, 0.0 }
 0x191   :  { %v3150_v29 = vmax.f32 %v525_v26, 0.0 }
 0x192   :  { %v536_v32 = vsel %vm274_vm1, %v3148_v28, 0.0 }
 0x193   :  { %v529_v33 = vsel %vm274_vm1, %v3150_v29, 0.0  ;;  %v537_v35 = vrot.slane %v536_v32, 4 }
 0x194   :  { %v530_v36 = vrot.slane %v529_v33, 4 }
 0x195   :  { %v538_v37 = vadd.f32 %v537_v35, %v536_v32 }
 0x196   :  { %v531_v38 = vadd.f32 %v530_v36, %v529_v33 }
 0x197   :  { %v539_v27 = vrot.slane %v538_v37, 2 }
 0x198   :  { %v532_v41 = vrot.slane %v531_v38, 2 }
 0x1fb   :  { %v188_v43 = vpop.permute.xlu0 %187  ;;  %v191_v44 = vpop.permute.xlu1 %190 }
 0x1fc   :  { %v197_v34 = vrot.slane %v188_v43, %v196_v42  ;;  %v201_v45 = vrot.slane %v191_v44, %v196_v42  ;;  %v1255_v48 = vmul.f32 %v2495_v30, %v188_v43  ;;  %v1256_v49 = vmul.f32 %v2495_v30, %v191_v44 }
 0x1fd   :  { %v533_v43 = vadd.f32 %v532_v41, %v531_v38 }
 0x1fe   :  { %v203_v47 = vsel %vm202_vm4, %v201_v45, %v197_v34 }
 0x1ff   :  { %v229_v50 = vpop.permute.xlu0 %228  ;;  %v226_v51 = vpop.permute.xlu1 %225  ;;  %v206_v52 = vsel %vm205_vm5, %v203_v47, 0.0  ;;  %v534_v40 = vrot.slane %v533_v43, 1 }
 0x200   :  { %v237_v53 = vrot.slane %v229_v50, %v196_v42  ;;  %v1267_v54 = vmul.f32 %v2496_v46, %v229_v50  ;;  %v233_v55 = vrot.slane %v226_v51, %v196_v42  ;;  %v1266_v56 = vmul.f32 %v2496_v46, %v226_v51  ;;  %207 = vadd.xlane.f32.xlu1 %v206_v52 }
 0x201   :  { %v540_v42 = vadd.f32 %v539_v27, %v538_v37  ;;  %v535_v30 = vadd.f32 %v534_v40, %v533_v43 }
 0x202   :  { %v1269_v58 = vadd.f32 %v1267_v54, %v1256_v49  ;;  %v1268_v59 = vadd.f32 %v1266_v56, %v1255_v48  ;;  %v238_v60 = vsel %vm202_vm4, %v237_v53, %v233_v55 }
 0x203   :  { %v240_v61 = vsel %vm205_vm5, %v238_v60, 0.0  ;;  %v541_v39 = vrot.slane %v540_v42, 1  ;;  %v543_v45 = vmul.f32 0.125, %v535_v30 }
 0x204   :  { %v1278_v62 = vadd.f32 %v2497_v57, %v1269_v58  ;;  %v1277_v63 = vadd.f32 %v2497_v57, %v1268_v59  ;;  %241 = vadd.xlane.f32.xlu0 %v240_v61 }
 0x205   :  { %v542_v44 = vadd.f32 %v541_v39, %v540_v42  ;;  %v545_v47 = vsub.f32 %v3150_v29, %v543_v45 }
 0x206   :  { %v1344_v2 = vrot.slane %v1278_v62, 7  ;;  %v1483_v3 = vrot.slane %v1277_v63, 1  ;;  %v1614_v4 = vrot.slane %v1277_v63, 2  ;;  %v1615_v5 = vrot.slane %v1278_v62, 1 }
 0x207   :  { %v1747_v6 = vrot.slane %v1277_v63, 3  ;;  %v1748_v7 = vrot.slane %v1278_v62, 2  ;;  %v1880_v8 = vrot.slane %v1277_v63, 4  ;;  %v1881_v9 = vrot.slane %v1278_v62, 3 }
 0x208   :  { %v3113_v10 = vsel %vm202_vm4, %v1344_v2, %v1277_v63  ;;  %v3116_v11 = vsel %vm202_vm4, %v1278_v62, %v1483_v3  ;;  %v3119_v12 = vsel %vm202_vm4, %v1615_v5, %v1614_v4  ;;  %v2013_v13 = vrot.slane %v1277_v63, 5 }
 0x209   :  { %v3122_v14 = vsel %vm202_vm4, %v1748_v7, %v1747_v6  ;;  %v3125_v15 = vsel %vm202_vm4, %v1881_v9, %v1880_v8  ;;  %v2014_v16 = vrot.slane %v1278_v62, 4  ;;  %v2146_v17 = vrot.slane %v1277_v63, 6 }
 0x20a   :  { %v2147_v18 = vrot.slane %v1278_v62, 5  ;;  %v2279_v0 = vrot.slane %v1277_v63, 7  ;;  %v2280_v19 = vrot.slane %v1278_v62, 6  ;;  %v544_v34 = vmul.f32 0.125, %v542_v44  ;;  %v603_v44 = vld [vmem:[%s3523_s4 + $0x10] sm:$0xff] }
 0x20b   :  { %v3128_v20 = vsel %vm202_vm4, %v2014_v16, %v2013_v13  ;;  %v547_v49 = vmul.f32 %v545_v47, %v545_v47  ;;  %v214_v63 = vsub.s32 0, %v3096_v31  ;;  %v218_v2 = vsub.s32 1, %v3096_v31 }
 0x20c   :  { %v3131_v1 = vsel %vm202_vm4, %v2147_v18, %v2146_v17  ;;  %v3134_v21 = vsel %vm202_vm4, %v2280_v19, %v2279_v0  ;;  %v546_v46 = vsub.f32 %v3148_v28, %v544_v34 }
 0x20d   :  { %v549_v51 = vsel %vm274_vm1, %v547_v49, 0.0  ;;  %v1281_v49 = vld [vmem:[%s3530_s11 + $0x10] sm:$0xff] }
 0x20e   :  { %v548_v48 = vmul.f32 %v546_v46, %v546_v46  ;;  %v550_v53 = vrot.slane %v549_v51, 4 }
 0x210   :  { %v556_v50 = vsel %vm274_vm1, %v548_v48, 0.0  ;;  %v551_v55 = vadd.f32 %v550_v53, %v549_v51  ;;  %v1279_v48 = vld [vmem:[%s3530_s11] sm:$0xff]  ;;  %v1284_v51 = vld [vmem:[%s3530_s11 + $0x28] sm:$0xff] }
 0x211   :  { %v557_v52 = vrot.slane %v556_v50, 4  ;;  %v3209_v53 = vpack.c.bf16 %v1281_v49, %v1279_v48 }
 0x212   :  { %v552_v57 = vrot.slane %v551_v55, 2 }
 0x213   :  { %v558_v54 = vadd.f32 %v557_v52, %v556_v50  ;;  %v1286_v52 = vld [vmem:[%s3530_s11 + $0x38] sm:$0xff] }
 0x214   :  { %v553_v59 = vadd.f32 %v552_v57, %v551_v55  ;;  %v1283_v55 = vld [vmem:[%s3530_s11 + $0x20] sm:$0xff] }
 0x215   :  { %v559_v56 = vrot.slane %v558_v54, 2 }
 0x216   :  { %v554_v60 = vrot.slane %v553_v59, 1 }
 0x217   :  { %v560_v58 = vadd.f32 %v559_v56, %v558_v54  ;;  %v3211_v54 = vpack.c.bf16 %v1286_v52, %v1284_v51  ;;  %v1285_v56 = vld [vmem:[%s3530_s11 + $0x30] sm:$0xff] }
 0x218   :  { %v555_v4 = vadd.f32 %v554_v60, %v553_v59  ;;  %v2940_v59 = vmov 0   ;;  %v931_v60 = vld [vmem:[%s3525_s6 + $0x10] sm:$0xff] }
 0x219   :  { %v561_v61 = vrot.slane %v560_v58, 1 }
 0x21a   :  { %v563_v13 = vmul.f32 0.125, %v555_v4  ;;  %v2483_v4 = vld [vmem:[%s3524_s5] ss:$0 sm:$0xff]  ;;  %s2946_s5 = smov [#allocation5]  }
 0x21b   :  { %v562_v5 = vadd.f32 %v561_v61, %v560_v58  ;;  %v3222_v58 = vpack.c.bf16 %v1285_v56, %v1283_v55  ;;  %v932_v61 = vld [vmem:[%s3525_s6 + $0x18] sm:$0xff] }
 0x21d   :  { %v564_v16 = vmul.f32 0.125, %v562_v5 }
 0x28d   :  { %v208_v62 = vpop.xlane.xlu1 %207 }
 0x28e   :  { %v210_v3 = vmul.f32 0.125, %v208_v62  ;;  %v2717_v62 = vpack.c.bf16 %v932_v61, %v931_v60 }
 0x290   :  { %v3162_v7 = vrot.slane %v210_v3, %v214_v63  ;;  %v3164_v8 = vrot.slane %v210_v3, %v218_v2  ;;  %2718 = vmatprep.subr.bf16.mxu0 %v2717_v62 }
 0x291   :  { %v242_v6 = vpop.xlane.xlu0 %241  ;;  %2720 = vmatpush3.bf16.msra.mxu0 %v2717_v62 }
 0x292   :  { %v243_v9 = vmul.f32 0.125, %v242_v6  ;;  %v565_v0 = vadd.f32 %v563_v13, %v3162_v7  ;;  %v566_v19 = vadd.f32 %v564_v16, %v3164_v8 }
 0x294   :  { %v248_v17 = vrot.slane %v243_v9, %v214_v63  ;;  %v252_v18 = vrot.slane %v243_v9, %v218_v2  ;;  %v929_v63 = vld [vmem:[%s3525_s6] sm:$0xff]  ;;  %v930_v2 = vld [vmem:[%s3525_s6 + $0x8] sm:$0xff] }
 0x295   :  { %v3240_v3 = vpack.c.bf16 %v930_v2, %v929_v63 }
 0x296   :  { %v3168_v22 = vmul.f32 0.5, %v248_v17  ;;  %v3170_v31 = vmul.f32 0.5, %v252_v18 }
 0x297   :  { %2722 = vmatprep.subr.bf16.mxu0 %v3240_v3 }
 0x298   :  { %v569_v24 = vadd.f32 %v3168_v22, %v565_v0  ;;  %v570_v25 = vadd.f32 %v3170_v31, %v566_v19 }
 0x29a   :  { %v571_v26 = vadd.f32 0.0001, %v569_v24  ;;  %v572_v32 = vadd.f32 0.0001, %v570_v25 }
 0x29c   :  { %v2475_v33 = vmul.f32 -1.442695, %v571_v26  ;;  %v2476_v35 = vmul.f32 -1.442695, %v572_v32 }
 0x29e   :  { %2778 = vpow2.f32 %v2475_v33 }
 0x29f   :  { %2780 = vpow2.f32 %v2476_v35 }
 0x2a8   :  { %v2779_v36 = vpop.eup %2778 }
 0x2a9   :  { %v2781_v37 = vpop.eup %2780  ;;  %v579_v38 = vadd.f32 1.0, %v2779_v36 }
 0x2aa   :  { %v580_v27 = vadd.f32 1.0, %v2781_v37 }
 0x2ab   :  { %2782 = vrcp.f32 %v579_v38 }
 0x2ac   :  { %2784 = vrcp.f32 %v580_v27 }
 0x2b5   :  { %v2783_v41 = vpop.eup %2782 }
 0x2b6   :  { %v2785_v42 = vpop.eup %2784  ;;  %v585_v43 = vmul.f32 %v2783_v41, %v3150_v29  ;;  %v1282_v29 = vld [vmem:[%s3530_s11 + $0x18] sm:$0xff] }
 0x2b7   :  { %v586_v39 = vmul.f32 %v2785_v42, %v3148_v28  ;;  %v1280_v28 = vld [vmem:[%s3530_s11 + $0x8] sm:$0xff] }
 0x2b8   :  { %2608 = vmatprep.mubr.msk.f32.mxu1 %vm274_vm1, %v585_v43  ;;  %v589_v40 = vrot.slane %v585_v43, 7  ;;  %v595_v45 = vrot.slane %v585_v43, 1  ;;  %v3190_v46 = vpack.c.bf16 %v1282_v29, %v1280_v28 }
 0x2b9   :  { %2609 = vmatmul.mubr.msk.f32.vlgmr.msra.gmra.mrb[0].mxu1 %vm274_vm1, %v586_v39  ;;  %v590_v34 = vrot.slane %v586_v39, 7  ;;  %v596_v50 = vrot.slane %v586_v39, 1 }
 0x2ba   :  { %2612 = vmatpush3.msra.mxu1 %v3142_v23  ;;  %v593_v30 = vsel %vm261_vm2, 0.0, %v589_v40  ;;  %v599_v23 = vsel %vm268_vm3, %v595_v45, 0.0 }
 0x2bb   :  { %2613 = vmatprep.mubr.msk.f32.mxu1 %vm274_vm1, %v593_v30  ;;  %2616 = vmatprep.subr.mxu1 %v603_v44  ;;  %v594_v47 = vsel %vm261_vm2, 0.0, %v590_v34  ;;  %v600_v57 = vsel %vm268_vm3, %v596_v50, 0.0 }
 0x2c1   :  { %2614 = vmatmul.mubr.msk.f32.vlgmr.msra.gmra.mrb[0].mxu1 %vm274_vm1, %v594_v47 }
 0x2c2   :  { %2617 = vmatpush3.msra.mxu1 %v603_v44  ;;  %2618 = vmatprep.mubr.msk.f32.mxu1 %vm274_vm1, %v599_v23 }
 0x2c3   :  { %1301 = vmatprep.subr.bf16.mxu1 %v3190_v46 }
 0x2c9   :  { %2619 = vmatmul.mubr.msk.f32.vlgmr.msra.gmra.mrb[0].mxu1 %vm274_vm1, %v600_v57 }
 0x2ca   :  { %1302 = vmatpush1.bf16.msra.mxu1 %v3209_v53  ;;  %1333 = vmatprep.mubr.bf16.mxu1 %v2940_v59 }
 0x2cb   :  { %1303 = vmatprep.subr.bf16.mxu1 %v3211_v54 }
 0x2ce   :  { %1304 = vmatpush1.bf16.msra.mxu1 %v3222_v58 }
 0x2d1   :  { %1334 = vmatmul.mubr.bf16.vlgmr.msra.gmra.mrb[4].mxu1 %v2940_v59 }
 0x39c   :  { %v2620_v5 = vpop.f32.mrb[0].mxu1 }
 0x39d   :  { %v855_v6 = vadd.f32 %v2620_v5, %v2483_v4  ;;  %v836_v9 = vpop.f32.mrb[1].mxu1 }
 0x39e   :  { %v854_v13 = vadd.f32 %v2483_v4, %v836_v9 }
 0x39f   :  { %v3246_v16 = vmax.f32 %v855_v6, 0.0 }
 0x3a0   :  { %v856_v17 = vmax.f32 %v854_v13, 0.0 }
 0x3a1   :  { %v866_v18 = vsel %vm858_vm6, %v3246_v16, 0.0 }
 0x3a2   :  { %v867_v0 = vrot.slane %v866_v18, 4  ;;  %v859_v19 = vsel %vm858_vm6, %v856_v17, 0.0 }
 0x3a3   :  { %v860_v24 = vrot.slane %v859_v19, 4 }
 0x3a4   :  { %v868_v25 = vadd.f32 %v867_v0, %v866_v18  ;;  %v3251_v26 = vpop.f32.mrb[4].mxu1 }
 0x3a5   :  { %v861_v32 = vadd.f32 %v860_v24, %v859_v19  ;;  %v1337_v33 = vpop.f32.mrb[5].mxu1 }
 0x3a6   :  { %v869_v35 = vrot.slane %v868_v25, 2  ;;  %v3254_v36 = vadd.f32 %v3113_v10, %v1337_v33  ;;  %v1339_v37 = vpop.f32.mrb[6].mxu1 }
 0x3a7   :  { %v862_v38 = vrot.slane %v861_v32, 2  ;;  %v1340_v27 = vpop.f32.mrb[7].mxu1 }
 0x3a8   :  { %v870_v41 = vadd.f32 %v869_v35, %v868_v25  ;;  %v934_v27 = vld [vmem:[%s3525_s6 + $0x28] sm:$0xff] }
 0x3a9   :  { %v863_v42 = vadd.f32 %v862_v38, %v861_v32  ;;  %v933_v38 = vld [vmem:[%s3525_s6 + $0x20] sm:$0xff] }
 0x3aa   :  { %v871_v43 = vrot.slane %v870_v41, 1 }
 0x3ab   :  { %v864_v39 = vrot.slane %v863_v42, 1 }
 0x3ac   :  { %v872_v40 = vadd.f32 %v871_v43, %v870_v41 }
 0x3ad   :  { %v865_v44 = vadd.f32 %v864_v39, %v863_v42  ;;  %v2725_v39 = vpack.c.bf16 %v934_v27, %v933_v38 }
 0x3ae   :  { %v874_v30 = vmul.f32 0.125, %v872_v40 }
 0x3af   :  { %v873_v34 = vmul.f32 0.125, %v865_v44 }
 0x3b0   :  { %v876_v28 = vsub.f32 %v3246_v16, %v874_v30 }
 0x3b1   :  { %v875_v29 = vsub.f32 %v856_v17, %v873_v34 }
 0x3b2   :  { %v878_v45 = vmul.f32 %v876_v28, %v876_v28 }
 0x3b3   :  { %v877_v47 = vmul.f32 %v875_v29, %v875_v29  ;;  %v1291_v29 = vld [vmem:[%s3531_s12] sm:$0xff] }
 0x3b4   :  { %v886_v23 = vsel %vm858_vm6, %v878_v45, 0.0  ;;  %v1292_v45 = vld [vmem:[%s3531_s12 + $0x8] sm:$0xff] }
 0x3b5   :  { %v887_v10 = vrot.slane %v886_v23, 4  ;;  %v879_v48 = vsel %vm858_vm6, %v877_v47, 0.0  ;;  %v3293_v47 = vpack.c.bf16 %v1292_v45, %v1291_v29 }
 0x3b6   :  { %v880_v49 = vrot.slane %v879_v48, 4 }
 0x3b7   :  { %v888_v50 = vadd.f32 %v887_v10, %v886_v23  ;;  %v1293_v23 = vld [vmem:[%s3531_s12 + $0x10] sm:$0xff]  ;;  %v1294_v10 = vld [vmem:[%s3531_s12 + $0x18] sm:$0xff] }
 0x3b8   :  { %v881_v51 = vadd.f32 %v880_v49, %v879_v48  ;;  %v2941_v48 = vmov 0.0   ;;  %v3305_v49 = vpack.c.bf16 %v1294_v10, %v1293_v23 }
 0x3b9   :  { %v889_v52 = vrot.slane %v888_v50, 2  ;;  %2642 = vmatprep.subr.bf16.mxu1 %v2941_v48  ;;  %2646 = vmatprep.mubr.msk.bf16.mxu1 %vm2942_vm7, %v2941_v48 }
 0x3ba   :  { %v882_v55 = vrot.slane %v881_v51, 2  ;;  %2643 = vmatpush3.bf16.msra.mxu1 %v3293_v47 }
 0x3bb   :  { %v890_v56 = vadd.f32 %v889_v52, %v888_v50  ;;  %2644 = vmatprep.subr.bf16.mxu1 %v2941_v48  ;;  %v2492_v50 = vld [vmem:[%s3526_s7] ss:$0 sm:$0xff] }
 0x3bc   :  { %v883_v57 = vadd.f32 %v882_v55, %v881_v51 }
 0x3bd   :  { %v891_v60 = vrot.slane %v890_v56, 1 }
 0x3be   :  { %v884_v61 = vrot.slane %v883_v57, 1  ;;  %2645 = vmatpush3.bf16.msra.mxu1 %v3305_v49 }
 0x3bf   :  { %v892_v62 = vadd.f32 %v891_v60, %v890_v56  ;;  %2650 = vmatprep.subr.bf16.mxu1 %v2941_v48 }
 0x3c0   :  { %v885_v63 = vadd.f32 %v884_v61, %v883_v57 }
 0x3c1   :  { %v894_v2 = vmul.f32 0.125, %v892_v62 }
 0x3c2   :  { %v893_v4 = vmul.f32 0.125, %v885_v63 }
 0x3c3   :  { %v896_v5 = vadd.f32 %v894_v2, %v3164_v8 }
 0x3c4   :  { %v895_v6 = vadd.f32 %v893_v4, %v3162_v7 }
 0x3c5   :  { %v898_v9 = vadd.f32 %v896_v5, %v3170_v31 }
 0x3c6   :  { %v897_v13 = vadd.f32 %v895_v6, %v3168_v22 }
 0x3c7   :  { %v900_v18 = vadd.f32 0.0001, %v898_v9 }
 0x3c8   :  { %v899_v0 = vadd.f32 0.0001, %v897_v13 }
 0x3c9   :  { %v2485_v19 = vmul.f32 -1.442695, %v900_v18 }
 0x3ca   :  { %v2484_v24 = vmul.f32 -1.442695, %v899_v0 }
 0x3cb   :  { %2786 = vpow2.f32 %v2485_v19 }
 0x3cc   :  { %2788 = vpow2.f32 %v2484_v24 }
 0x3d5   :  { %v2787_v25 = vpop.eup %2786 }
 0x3d6   :  { %v2789_v32 = vpop.eup %2788  ;;  %v908_v33 = vadd.f32 1.0, %v2787_v25 }
 0x3d7   :  { %v907_v35 = vadd.f32 1.0, %v2789_v32 }
 0x3d8   :  { %2790 = vrcp.f32 %v908_v33 }
 0x3d9   :  { %2792 = vrcp.f32 %v907_v35 }
 0x3e2   :  { %v2791_v37 = vpop.eup %2790 }
 0x3e3   :  { %v2793_v41 = vpop.eup %2792  ;;  %v914_v43 = vmul.f32 %v2791_v37, %v3246_v16 }
 0x3e4   :  { %v913_v42 = vmul.f32 %v2793_v41, %v856_v17 }
 0x3e5   :  { %v918_v30 = vrot.slane %v914_v43, 7  ;;  %v924_v17 = vrot.slane %v914_v43, 1 }
 0x3e6   :  { %2625 = vmatprep.mubr.msk.f32.mxu0 %vm858_vm6, %v913_v42  ;;  %v917_v40 = vrot.slane %v913_v42, 7  ;;  %v923_v34 = vrot.slane %v913_v42, 1 }
 0x3e7   :  { %2626 = vmatmul.mubr.msk.f32.vlgmr.msra.gmra.mrb[2].mxu0 %vm858_vm6, %v914_v43  ;;  %v922_v28 = vsel %vm261_vm2, 0.0, %v918_v30 }
 0x3e8   :  { %2724 = vmatpush3.bf16.msra.mxu0 %v3240_v3  ;;  %v921_v44 = vsel %vm261_vm2, 0.0, %v917_v40  ;;  %v927_v16 = vsel %vm268_vm3, %v923_v34, 0.0  ;;  %v928_v3 = vsel %vm268_vm3, %v924_v17, 0.0 }
 0x3e9   :  { %2632 = vmatprep.mubr.msk.f32.mxu0 %vm858_vm6, %v921_v44  ;;  %2726 = vmatprep.subr.bf16.mxu0 %v2725_v39 }
 0x3ef   :  { %2633 = vmatmul.mubr.msk.f32.vlgmr.msra.gmra.mrb[2].mxu0 %vm858_vm6, %v922_v28 }
 0x3f0   :  { %2728 = vmatpush3.bf16.msra.mxu0 %v2725_v39  ;;  %2639 = vmatprep.mubr.msk.f32.mxu0 %vm858_vm6, %v927_v16 }
 0x3f1   :  { %1442 = vmatprep.subr.bf16.mxu0 %v3190_v46 }
 0x3f7   :  { %2640 = vmatmul.mubr.msk.f32.vlgmr.msra.gmra.mrb[2].mxu0 %vm858_vm6, %v928_v3 }
 0x3f8   :  { %1443 = vmatpush1.bf16.msra.mxu0 %v3209_v53  ;;  %1474 = vmatprep.mubr.bf16.mxu0 %v2940_v59 }
 0x3f9   :  { %1444 = vmatprep.subr.bf16.mxu0 %v3211_v54 }
 0x3fc   :  { %1445 = vmatpush1.bf16.msra.mxu0 %v3222_v58 }
 0x3fd   :  { %1573 = vmatprep.subr.bf16.mxu0 %v3190_v46 }
 0x4ca   :  { %v2641_v51 = vpop.f32.mrb[2].mxu0 }
 0x4cb   :  { %v1186_v52 = vadd.f32 %v2641_v51, %v2492_v50  ;;  %v1167_v55 = vpop.f32.mrb[3].mxu0 }
 0x4cc   :  { %v1185_v56 = vadd.f32 %v2492_v50, %v1167_v55  ;;  %v2498_v55 = vmul.f32 -1.442695, %v3254_v36 }
 0x4cd   :  { %v1188_v57 = vmax.f32 %v1186_v52, 0.0 }
 0x4ce   :  { %v1187_v60 = vmax.f32 %v1185_v56, 0.0  ;;  %2794 = vpow2.f32 %v2498_v55 }
 0x4cf   :  { %v1197_v61 = vsel %vm1189_vm8, %v1188_v57, 0.0 }
 0x4d0   :  { %v1198_v62 = vrot.slane %v1197_v61, 4  ;;  %v1190_v63 = vsel %vm1189_vm8, %v1187_v60, 0.0 }
 0x4d1   :  { %v1191_v2 = vrot.slane %v1190_v63, 4 }
 0x4d2   :  { %v1199_v4 = vadd.f32 %v1198_v62, %v1197_v61 }
 0x4d3   :  { %v1192_v5 = vadd.f32 %v1191_v2, %v1190_v63 }
 0x4d4   :  { %v1200_v6 = vrot.slane %v1199_v4, 2 }
 0x4d5   :  { %v1193_v9 = vrot.slane %v1192_v5, 2 }
 0x4d6   :  { %v1201_v13 = vadd.f32 %v1200_v6, %v1199_v4 }
 0x4d7   :  { %v1194_v18 = vadd.f32 %v1193_v9, %v1192_v5 }
 0x4d8   :  { %v1202_v0 = vrot.slane %v1201_v13, 1  ;;  %v2795_v4 = vpop.eup %2794 }
 0x4d9   :  { %v1195_v19 = vrot.slane %v1194_v18, 1 }
 0x4da   :  { %v1203_v24 = vadd.f32 %v1202_v0, %v1201_v13 }
 0x4db   :  { %v1196_v25 = vadd.f32 %v1195_v19, %v1194_v18 }
 0x4dc   :  { %v1205_v32 = vmul.f32 0.125, %v1203_v24 }
 0x4dd   :  { %v1204_v33 = vmul.f32 0.125, %v1196_v25 }
 0x4de   :  { %v1207_v35 = vsub.f32 %v1188_v57, %v1205_v32 }
 0x4df   :  { %v1206_v37 = vsub.f32 %v1187_v60, %v1204_v33 }
 0x4e0   :  { %v1209_v38 = vmul.f32 %v1207_v35, %v1207_v35 }
 0x4e1   :  { %v1208_v27 = vmul.f32 %v1206_v37, %v1206_v37 }
 0x4e2   :  { %v1217_v41 = vsel %vm1189_vm8, %v1209_v38, 0.0 }
 0x4e3   :  { %v1218_v42 = vrot.slane %v1217_v41, 4  ;;  %v1210_v43 = vsel %vm1189_vm8, %v1208_v27, 0.0 }
 0x4e4   :  { %v1211_v39 = vrot.slane %v1210_v43, 4 }
 0x4e5   :  { %v1219_v40 = vadd.f32 %v1218_v42, %v1217_v41 }
 0x4e6   :  { %v1212_v44 = vadd.f32 %v1211_v39, %v1210_v43 }
 0x4e7   :  { %v1220_v30 = vrot.slane %v1219_v40, 2 }
 0x4e8   :  { %v1213_v34 = vrot.slane %v1212_v44, 2 }
 0x4e9   :  { %v1221_v28 = vadd.f32 %v1220_v30, %v1219_v40 }
 0x4ea   :  { %v1214_v16 = vadd.f32 %v1213_v34, %v1212_v44 }
 0x4eb   :  { %v1222_v17 = vrot.slane %v1221_v28, 1 }
 0x4ec   :  { %v1215_v3 = vrot.slane %v1214_v16, 1 }
 0x4ed   :  { %v1223_v29 = vadd.f32 %v1222_v17, %v1221_v28 }
 0x4ee   :  { %v1216_v45 = vadd.f32 %v1215_v3, %v1214_v16 }
 0x4ef   :  { %v1225_v23 = vmul.f32 0.125, %v1223_v29  ;;  %v3354_v29 = vld [vmem:[%s3532_s13] ss:$0 sm:$0xff]  ;;  %s2944_s13 = smov 32  }
 0x4f0   :  { %v1224_v10 = vmul.f32 0.125, %v1216_v45 }
 0x4f1   :  { %v1227_v50 = vadd.f32 %v1225_v23, %v3164_v8 }
 0x4f2   :  { %v1226_v51 = vadd.f32 %v1224_v10, %v3162_v7  ;;  %v1351_v7 = vadd.f32 1.0, %v2795_v4 }
 0x4f3   :  { %v1229_v52 = vadd.f32 %v1227_v50, %v3170_v31 }
 0x4f4   :  { %v1228_v56 = vadd.f32 %v1226_v51, %v3168_v22 }
 0x4f5   :  { %v1231_v61 = vadd.f32 0.0001, %v1229_v52 }
 0x4f6   :  { %v1230_v62 = vadd.f32 0.0001, %v1228_v56 }
 0x4f7   :  { %v2494_v63 = vmul.f32 -1.442695, %v1231_v61 }
 0x4f8   :  { %v2493_v2 = vmul.f32 -1.442695, %v1230_v62 }
 0x4f9   :  { %2796 = vpow2.f32 %v2494_v63 }
 0x4fa   :  { %2798 = vpow2.f32 %v2493_v2 }
 0x503   :  { %v2797_v5 = vpop.eup %2796 }
 0x504   :  { %v2799_v6 = vpop.eup %2798  ;;  %v1239_v9 = vadd.f32 1.0, %v2797_v5 }
 0x505   :  { %v1238_v8 = vadd.f32 1.0, %v2799_v6 }
 0x506   :  { %2800 = vrcp.f32 %v1239_v9 }
 0x507   :  { %2802 = vrcp.f32 %v1238_v8 }
 0x508   :  { %2804 = vrcp.f32 %v1351_v7 }
 0x510   :  { %v2801_v31 = vpop.eup %2800 }
 0x511   :  { %v2803_v36 = vpop.eup %2802  ;;  %v1245_v13 = vmul.f32 %v2801_v31, %v1188_v57 }
 0x512   :  { %v1244_v22 = vmul.f32 %v2803_v36, %v1187_v60  ;;  %v2805_v37 = vpop.eup %2804 }
 0x513   :  { %v1356_v18 = vrot.slane %v1245_v13, 7  ;;  %v1626_v0 = vrot.slane %v1245_v13, 1  ;;  %v1759_v19 = vrot.slane %v1245_v13, 2  ;;  %v1892_v24 = vrot.slane %v1245_v13, 3 }
 0x514   :  { %v1493_v25 = vrot.slane %v1244_v22, 1  ;;  %v1625_v32 = vrot.slane %v1244_v22, 2  ;;  %v1758_v33 = vrot.slane %v1244_v22, 3  ;;  %v1891_v35 = vrot.slane %v1244_v22, 4 }
 0x515   :  { %v1357_v38 = vsel %vm202_vm4, %v1356_v18, %v1244_v22  ;;  %v2024_v27 = vrot.slane %v1244_v22, 5  ;;  %v2025_v41 = vrot.slane %v1245_v13, 4  ;;  %v2157_v42 = vrot.slane %v1244_v22, 6 }
 0x516   :  { %v1359_v43 = vmul.f32 %v2805_v37, %v1357_v38  ;;  %v3324_v39 = vsel %vm202_vm4, %v1245_v13, %v1493_v25  ;;  %v3327_v57 = vsel %vm202_vm4, %v1626_v0, %v1625_v32  ;;  %v3330_v60 = vsel %vm202_vm4, %v1759_v19, %v1758_v33 }
 0x517   :  { %v3333_v40 = vsel %vm202_vm4, %v1892_v24, %v1891_v35  ;;  %v3336_v44 = vsel %vm202_vm4, %v2025_v41, %v2024_v27  ;;  %v2158_v30 = vrot.slane %v1245_v13, 5  ;;  %v2290_v34 = vrot.slane %v1244_v22, 7 }
 0x518   :  { %v1360_v28 = vpack.c.bf16 %v1359_v43, %v1359_v43  ;;  %v2291_v16 = vrot.slane %v1245_v13, 6 }
 0x519   :  { %v3339_v17 = vsel %vm202_vm4, %v2158_v30, %v2157_v42 }
 0x51a   :  { %2647 = vmatmul.mubr.msk.bf16.vlgmr.msra.gmra.mrb[8].mxu1 %vm1189_vm8, %v1360_v28  ;;  %v3343_v3 = vsel %vm202_vm4, %v2291_v16, %v2290_v34 }
 0x51b   :  { %2651 = vmatpush3.bf16.msra.mxu1 %v3293_v47  ;;  %2654 = vmatprep.mubr.msk.bf16.mxu1 %vm2942_vm7, %v2941_v48 }
 0x51c   :  { %2652 = vmatprep.subr.bf16.mxu1 %v2941_v48 }
 0x51f   :  { %2653 = vmatpush3.bf16.msra.mxu1 %v3305_v49 }
 0x520   :  { %2658 = vmatprep.subr.bf16.mxu1 %v2941_v48 }
 0x5ed   :  { %v1398_v45 = vpop.f32.mrb[8].mxu1 }
 0x5ee   :  { %v1399_v23 = vadd.f32 %v1398_v45, %v3251_v26  ;;  %v2648_v10 = vpop.f32.mrb[9].mxu1 }
 0x5ef   :  { %v1401_v50 = vpop.f32.mrb[10].mxu1 }
 0x5f0   :  { %v1410_v51 = vadd.f32 %v3354_v29, %v1399_v23  ;;  %v2649_v52 = vpop.f32.mrb[11].mxu1 }
 0x5f2   :  { %2806 = vtanh.f32 %v1410_v51  ;;  %v2501_v56 = vmul.f32 -1.442695, %v1410_v51 }
 0x5f4   :  { %2808 = vpow2.f32 %v2501_v56 }
 0x5fc   :  { %v2807_v55 = vpop.eup %2806 }
 0x5fd   :  { %1420 = vrot.lane.b32.xlu0 %v2807_v55, %s2943_s10 }
 0x5fe   :  { %v2809_v61 = vpop.eup %2808 }
 0x5ff   :  { %v1414_v62 = vadd.f32 1.0, %v2809_v61 }
 0x601   :  { %2810 = vrcp.f32 %v1414_v62 }
 0x60b   :  { %v2811_v63 = vpop.eup %2810 }
 0x60c   :  { %v1418_v26 = vmul.f32 0.0, %v2811_v63 }
 0x66f   :  { %v1421_v2 = vpop.permute.xlu0 %1420 }
 0x670   :  { %v1423_v4 = vmul.f32 %v2811_v63, %v1421_v2 }
 0x672   :  { %1425 = vrot.lane.b32.xlu1 %v1423_v4, %s2944_s13 }
 0x6e4   :  { %v1426_v5 = vpop.permute.xlu1 %1425 }
 0x6e5   :  { %v1428_v6 = vadd.f32 %v1426_v5, %v1418_v26 }
 0x6e7   :  { %2812 = vtanh.f32 %v1428_v6 }
 0x6f1   :  { %v2813_v9 = vpop.eup %2812 }
 0x6f2   :  { %1431 = vrot.lane.b32.xlu1 %v2813_v9, %s2943_s10 }
 0x764   :  { %v1432_v8 = vpop.permute.xlu1 %1431 }
 0x765   :  { %v1434_v7 = vmul.f32 %v2811_v63, %v1432_v8 }
 0x767   :  { %v1435_v31 = vpack.c.bf16 %v1434_v7, %v1434_v7 }
 0x769   :  { %1437 = vrot.lane.b32.xlu0 %v1435_v31, %s2944_s13 }
 0x7db   :  { %v1438_v36 = vpop.permute.xlu0 %1437 }
 0x7dc   :  { %2502 = vmatmul.mubr.msk.bf16.vlgmr.msra.gmra.mrb[4].mxu0 %vm1189_vm8, %v1438_v36 }
 0x7dd   :  { %1574 = vmatpush1.bf16.msra.mxu0 %v3209_v53  ;;  %1605 = vmatprep.mubr.bf16.mxu0 %v2940_v59 }
 0x7de   :  { %1575 = vmatprep.subr.bf16.mxu0 %v3211_v54 }
 0x7e1   :  { %1576 = vmatpush1.bf16.msra.mxu0 %v3222_v58 }
 0x7e2   :  { %1706 = vmatprep.subr.bf16.mxu0 %v3190_v46 }
 0x8af   :  { %v1476_v13 = vpop.f32.mrb[4].mxu0 }
 0x8b0   :  { %v1478_v22 = vpop.f32.mrb[5].mxu0 }
 0x8b1   :  { %v1486_v18 = vadd.f32 %v3116_v11, %v1478_v22  ;;  %v1480_v0 = vpop.f32.mrb[6].mxu0 }
 0x8b2   :  { %v1481_v19 = vpop.f32.mrb[7].mxu0 }
 0x8b3   :  { %v2503_v24 = vmul.f32 -1.442695, %v1486_v18 }
 0x8b5   :  { %2814 = vpow2.f32 %v2503_v24 }
 0x8bf   :  { %v2815_v25 = vpop.eup %2814 }
 0x8c0   :  { %v1490_v32 = vadd.f32 1.0, %v2815_v25 }
 0x8c2   :  { %2816 = vrcp.f32 %v1490_v32 }
 0x8cc   :  { %v2817_v33 = vpop.eup %2816 }
 0x8cd   :  { %v1496_v35 = vmul.f32 %v2817_v33, %v3324_v39 }
 0x8cf   :  { %v1497_v37 = vpack.c.bf16 %v1496_v35, %v1496_v35 }
 0x8d1   :  { %2655 = vmatmul.mubr.msk.bf16.vlgmr.msra.gmra.mrb[12].mxu1 %vm1189_vm8, %v1497_v37 }
 0x8d2   :  { %2659 = vmatpush3.bf16.msra.mxu1 %v3293_v47  ;;  %2662 = vmatprep.mubr.msk.bf16.mxu1 %vm2942_vm7, %v2941_v48 }
 0x8d3   :  { %2660 = vmatprep.subr.bf16.mxu1 %v2941_v48 }
 0x8d6   :  { %2661 = vmatpush3.bf16.msra.mxu1 %v3305_v49 }
 0x8d7   :  { %2666 = vmatprep.subr.bf16.mxu1 %v2941_v48 }
 0x9a4   :  { %v1535_v11 = vpop.f32.mrb[12].mxu1 }
 0x9a5   :  { %v1536_v38 = vadd.f32 %v1535_v11, %v1476_v13  ;;  %v2656_v27 = vpop.f32.mrb[13].mxu1 }
 0x9a6   :  { %v1538_v41 = vpop.f32.mrb[14].mxu1 }
 0x9a7   :  { %v1541_v42 = vadd.f32 %v3354_v29, %v1536_v38  ;;  %v2657_v43 = vpop.f32.mrb[15].mxu1 }
 0x9a9   :  { %2818 = vtanh.f32 %v1541_v42  ;;  %v2505_v30 = vmul.f32 -1.442695, %v1541_v42 }
 0x9ab   :  { %2820 = vpow2.f32 %v2505_v30 }
 0x9b3   :  { %v2819_v39 = vpop.eup %2818 }
 0x9b4   :  { %1551 = vrot.lane.b32.xlu1 %v2819_v39, %s2943_s10 }
 0x9b5   :  { %v2821_v34 = vpop.eup %2820 }
 0x9b6   :  { %v1545_v28 = vadd.f32 1.0, %v2821_v34 }
 0x9b8   :  { %2822 = vrcp.f32 %v1545_v28 }
 0x9c2   :  { %v2823_v16 = vpop.eup %2822 }
 0x9c3   :  { %v1549_v10 = vmul.f32 %v2823_v16, %v1428_v6 }
 0xa26   :  { %v1552_v45 = vpop.permute.xlu1 %1551 }
 0xa27   :  { %v1554_v23 = vmul.f32 %v2823_v16, %v1552_v45 }
 0xa29   :  { %1556 = vrot.lane.b32.xlu0 %v1554_v23, %s2944_s13 }
 0xa9b   :  { %v1557_v50 = vpop.permute.xlu0 %1556 }
 0xa9c   :  { %v1559_v51 = vadd.f32 %v1557_v50, %v1549_v10 }
 0xa9e   :  { %2824 = vtanh.f32 %v1559_v51 }
 0xaa8   :  { %v2825_v52 = vpop.eup %2824 }
 0xaa9   :  { %1562 = vrot.lane.b32.xlu1 %v2825_v52, %s2943_s10 }
 0xb1b   :  { %v1563_v55 = vpop.permute.xlu1 %1562 }
 0xb1c   :  { %v1565_v56 = vmul.f32 %v2823_v16, %v1563_v55 }
 0xb1e   :  { %v1566_v61 = vpack.c.bf16 %v1565_v56, %v1565_v56 }
 0xb20   :  { %1568 = vrot.lane.b32.xlu0 %v1566_v61, %s2944_s13 }
 0xb92   :  { %v1569_v62 = vpop.permute.xlu0 %1568 }
 0xb93   :  { %2506 = vmatmul.mubr.msk.bf16.vlgmr.msra.gmra.mrb[8].mxu0 %vm1189_vm8, %v1569_v62 }
 0xb94   :  { %1707 = vmatpush1.bf16.msra.mxu0 %v3209_v53  ;;  %1738 = vmatprep.mubr.bf16.mxu0 %v2940_v59 }
 0xb95   :  { %1708 = vmatprep.subr.bf16.mxu0 %v3211_v54 }
 0xb98   :  { %1709 = vmatpush1.bf16.msra.mxu0 %v3222_v58 }
 0xb99   :  { %1839 = vmatprep.subr.bf16.mxu0 %v3190_v46 }
 0xc66   :  { %v1607_v63 = vpop.f32.mrb[8].mxu0 }
 0xc67   :  { %v1609_v2 = vpop.f32.mrb[9].mxu0 }
 0xc68   :  { %v1618_v4 = vadd.f32 %v3119_v12, %v1609_v2  ;;  %v1611_v26 = vpop.f32.mrb[10].mxu0 }
 0xc69   :  { %v1612_v5 = vpop.f32.mrb[11].mxu0 }
 0xc6a   :  { %v2507_v6 = vmul.f32 -1.442695, %v1618_v4 }
 0xc6c   :  { %2826 = vpow2.f32 %v2507_v6 }
 0xc76   :  { %v2827_v9 = vpop.eup %2826 }
 0xc77   :  { %v1622_v8 = vadd.f32 1.0, %v2827_v9 }
 0xc79   :  { %2828 = vrcp.f32 %v1622_v8 }
 0xc83   :  { %v2829_v7 = vpop.eup %2828 }
 0xc84   :  { %v1629_v31 = vmul.f32 %v2829_v7, %v3327_v57 }
 0xc86   :  { %v1630_v36 = vpack.c.bf16 %v1629_v31, %v1629_v31 }
 0xc88   :  { %2663 = vmatmul.mubr.msk.bf16.vlgmr.msra.gmra.mrb[16].mxu1 %vm1189_vm8, %v1630_v36 }
 0xc89   :  { %2667 = vmatpush3.bf16.msra.mxu1 %v3293_v47  ;;  %2670 = vmatprep.mubr.msk.bf16.mxu1 %vm2942_vm7, %v2941_v48 }
 0xc8a   :  { %2668 = vmatprep.subr.bf16.mxu1 %v2941_v48 }
 0xc8d   :  { %2669 = vmatpush3.bf16.msra.mxu1 %v3305_v49 }
 0xc8e   :  { %2674 = vmatprep.subr.bf16.mxu1 %v2941_v48 }
 0xd5b   :  { %v1668_v12 = vpop.f32.mrb[16].mxu1 }
 0xd5c   :  { %v1669_v13 = vadd.f32 %v1668_v12, %v1607_v63  ;;  %v2664_v22 = vpop.f32.mrb[17].mxu1 }
 0xd5d   :  { %v1671_v18 = vpop.f32.mrb[18].mxu1 }
 0xd5e   :  { %v1674_v57 = vadd.f32 %v3354_v29, %v1669_v13  ;;  %v2665_v0 = vpop.f32.mrb[19].mxu1 }
 0xd60   :  { %2830 = vtanh.f32 %v1674_v57  ;;  %v2509_v24 = vmul.f32 -1.442695, %v1674_v57 }
 0xd62   :  { %2832 = vpow2.f32 %v2509_v24 }
 0xd6a   :  { %v2831_v19 = vpop.eup %2830 }
 0xd6b   :  { %1684 = vrot.lane.b32.xlu1 %v2831_v19, %s2943_s10 }
 0xd6c   :  { %v2833_v25 = vpop.eup %2832 }
 0xd6d   :  { %v1678_v32 = vadd.f32 1.0, %v2833_v25 }
 0xd6f   :  { %2834 = vrcp.f32 %v1678_v32 }
 0xd79   :  { %v2835_v33 = vpop.eup %2834 }
 0xd7a   :  { %v1682_v11 = vmul.f32 %v2835_v33, %v1559_v51 }
 0xddd   :  { %v1685_v35 = vpop.permute.xlu1 %1684 }
 0xdde   :  { %v1687_v37 = vmul.f32 %v2835_v33, %v1685_v35 }
 0xde0   :  { %1689 = vrot.lane.b32.xlu0 %v1687_v37, %s2944_s13 }
 0xe52   :  { %v1690_v38 = vpop.permute.xlu0 %1689 }
 0xe53   :  { %v1692_v27 = vadd.f32 %v1690_v38, %v1682_v11 }
 0xe55   :  { %2836 = vtanh.f32 %v1692_v27 }
 0xe5f   :  { %v2837_v41 = vpop.eup %2836 }
 0xe60   :  { %1695 = vrot.lane.b32.xlu1 %v2837_v41, %s2943_s10 }
 0xed2   :  { %v1696_v42 = vpop.permute.xlu1 %1695 }
 0xed3   :  { %v1698_v43 = vmul.f32 %v2835_v33, %v1696_v42 }
 0xed5   :  { %v1699_v39 = vpack.c.bf16 %v1698_v43, %v1698_v43 }
 0xed7   :  { %1701 = vrot.lane.b32.xlu0 %v1699_v39, %s2944_s13 }
 0xf49   :  { %v1702_v30 = vpop.permute.xlu0 %1701 }
 0xf4a   :  { %2510 = vmatmul.mubr.msk.bf16.vlgmr.msra.gmra.mrb[12].mxu0 %vm1189_vm8, %v1702_v30 }
 0xf4b   :  { %1840 = vmatpush1.bf16.msra.mxu0 %v3209_v53  ;;  %1871 = vmatprep.mubr.bf16.mxu0 %v2940_v59 }
 0xf4c   :  { %1841 = vmatprep.subr.bf16.mxu0 %v3211_v54 }
 0xf4f   :  { %1842 = vmatpush1.bf16.msra.mxu0 %v3222_v58 }
 0xf50   :  { %1972 = vmatprep.subr.bf16.mxu0 %v3190_v46 }
0x101d   :  { %v1740_v34 = vpop.f32.mrb[12].mxu0 }
0x101e   :  { %v1742_v28 = vpop.f32.mrb[13].mxu0 }
0x101f   :  { %v1751_v16 = vadd.f32 %v3122_v14, %v1742_v28  ;;  %v1744_v45 = vpop.f32.mrb[14].mxu0 }
0x1020   :  { %v1745_v23 = vpop.f32.mrb[15].mxu0 }
0x1021   :  { %v2511_v10 = vmul.f32 -1.442695, %v1751_v16 }
0x1023   :  { %2838 = vpow2.f32 %v2511_v10 }
0x102d   :  { %v2839_v50 = vpop.eup %2838 }
0x102e   :  { %v1755_v51 = vadd.f32 1.0, %v2839_v50 }
0x1030   :  { %2840 = vrcp.f32 %v1755_v51 }
0x103a   :  { %v2841_v52 = vpop.eup %2840 }
0x103b   :  { %v1762_v55 = vmul.f32 %v2841_v52, %v3330_v60 }
0x103d   :  { %v1763_v56 = vpack.c.bf16 %v1762_v55, %v1762_v55 }
0x103f   :  { %2671 = vmatmul.mubr.msk.bf16.vlgmr.msra.gmra.mrb[20].mxu1 %vm1189_vm8, %v1763_v56 }
0x1040   :  { %2675 = vmatpush3.bf16.msra.mxu1 %v3293_v47  ;;  %2678 = vmatprep.mubr.msk.bf16.mxu1 %vm2942_vm7, %v2941_v48 }
0x1041   :  { %2676 = vmatprep.subr.bf16.mxu1 %v2941_v48 }
0x1044   :  { %2677 = vmatpush3.bf16.msra.mxu1 %v3305_v49 }
0x1045   :  { %2682 = vmatprep.subr.bf16.mxu1 %v2941_v48 }
0x1112   :  { %v1801_v14 = vpop.f32.mrb[20].mxu1 }
0x1113   :  { %v1802_v61 = vadd.f32 %v1801_v14, %v1740_v34  ;;  %v2672_v62 = vpop.f32.mrb[21].mxu1 }
0x1114   :  { %v1804_v63 = vpop.f32.mrb[22].mxu1 }
0x1115   :  { %v1807_v60 = vadd.f32 %v3354_v29, %v1802_v61  ;;  %v2673_v2 = vpop.f32.mrb[23].mxu1 }
0x1117   :  { %2842 = vtanh.f32 %v1807_v60  ;;  %v2513_v26 = vmul.f32 -1.442695, %v1807_v60 }
0x1119   :  { %2844 = vpow2.f32 %v2513_v26 }
0x1121   :  { %v2843_v4 = vpop.eup %2842 }
0x1122   :  { %1817 = vrot.lane.b32.xlu1 %v2843_v4, %s2943_s10 }
0x1123   :  { %v2845_v5 = vpop.eup %2844 }
0x1124   :  { %v1811_v6 = vadd.f32 1.0, %v2845_v5 }
0x1126   :  { %2846 = vrcp.f32 %v1811_v6 }
0x1130   :  { %v2847_v9 = vpop.eup %2846 }
0x1131   :  { %v1815_v31 = vmul.f32 %v2847_v9, %v1692_v27 }
0x1194   :  { %v1818_v8 = vpop.permute.xlu1 %1817 }
0x1195   :  { %v1820_v7 = vmul.f32 %v2847_v9, %v1818_v8 }
0x1197   :  { %1822 = vrot.lane.b32.xlu0 %v1820_v7, %s2944_s13 }
0x1209   :  { %v1823_v36 = vpop.permute.xlu0 %1822 }
0x120a   :  { %v1825_v12 = vadd.f32 %v1823_v36, %v1815_v31 }
0x120c   :  { %2848 = vtanh.f32 %v1825_v12 }
0x1216   :  { %v2849_v13 = vpop.eup %2848 }
0x1217   :  { %1828 = vrot.lane.b32.xlu1 %v2849_v13, %s2943_s10 }
0x1289   :  { %v1829_v22 = vpop.permute.xlu1 %1828 }
0x128a   :  { %v1831_v18 = vmul.f32 %v2847_v9, %v1829_v22 }
0x128c   :  { %v1832_v57 = vpack.c.bf16 %v1831_v18, %v1831_v18 }
0x128e   :  { %1834 = vrot.lane.b32.xlu0 %v1832_v57, %s2944_s13 }
0x1300   :  { %v1835_v0 = vpop.permute.xlu0 %1834 }
0x1301   :  { %2514 = vmatmul.mubr.msk.bf16.vlgmr.msra.gmra.mrb[16].mxu0 %vm1189_vm8, %v1835_v0 }
0x1302   :  { %1973 = vmatpush1.bf16.msra.mxu0 %v3209_v53  ;;  %2004 = vmatprep.mubr.bf16.mxu0 %v2940_v59 }
0x1303   :  { %1974 = vmatprep.subr.bf16.mxu0 %v3211_v54 }
0x1306   :  { %1975 = vmatpush1.bf16.msra.mxu0 %v3222_v58 }
0x1307   :  { %2105 = vmatprep.subr.bf16.mxu0 %v3190_v46 }
0x13d4   :  { %v1873_v19 = vpop.f32.mrb[16].mxu0 }
0x13d5   :  { %v1875_v24 = vpop.f32.mrb[17].mxu0 }
0x13d6   :  { %v1884_v25 = vadd.f32 %v3125_v15, %v1875_v24  ;;  %v1877_v32 = vpop.f32.mrb[18].mxu0 }
0x13d7   :  { %v1878_v33 = vpop.f32.mrb[19].mxu0 }
0x13d8   :  { %v2515_v35 = vmul.f32 -1.442695, %v1884_v25 }
0x13da   :  { %2850 = vpow2.f32 %v2515_v35 }
0x13e4   :  { %v2851_v37 = vpop.eup %2850 }
0x13e5   :  { %v1888_v11 = vadd.f32 1.0, %v2851_v37 }
0x13e7   :  { %2852 = vrcp.f32 %v1888_v11 }
0x13f1   :  { %v2853_v38 = vpop.eup %2852 }
0x13f2   :  { %v1895_v27 = vmul.f32 %v2853_v38, %v3333_v40 }
0x13f4   :  { %v1896_v41 = vpack.c.bf16 %v1895_v27, %v1895_v27 }
0x13f6   :  { %2679 = vmatmul.mubr.msk.bf16.vlgmr.msra.gmra.mrb[24].mxu1 %vm1189_vm8, %v1896_v41 }
0x13f7   :  { %2683 = vmatpush3.bf16.msra.mxu1 %v3293_v47  ;;  %2686 = vmatprep.mubr.msk.bf16.mxu1 %vm2942_vm7, %v2941_v48 }
0x13f8   :  { %2684 = vmatprep.subr.bf16.mxu1 %v2941_v48 }
0x13fb   :  { %2685 = vmatpush3.bf16.msra.mxu1 %v3305_v49 }
0x13fc   :  { %2690 = vmatprep.subr.bf16.mxu1 %v2941_v48 }
0x14c9   :  { %v1934_v15 = vpop.f32.mrb[24].mxu1 }
0x14ca   :  { %v1935_v42 = vadd.f32 %v1934_v15, %v1873_v19  ;;  %v2680_v43 = vpop.f32.mrb[25].mxu1 }
0x14cb   :  { %v1937_v39 = vpop.f32.mrb[26].mxu1 }
0x14cc   :  { %v1940_v40 = vadd.f32 %v3354_v29, %v1935_v42  ;;  %v2681_v30 = vpop.f32.mrb[27].mxu1 }
0x14ce   :  { %2854 = vtanh.f32 %v1940_v40  ;;  %v2517_v28 = vmul.f32 -1.442695, %v1940_v40 }
0x14d0   :  { %2856 = vpow2.f32 %v2517_v28 }
0x14d8   :  { %v2855_v34 = vpop.eup %2854 }
0x14d9   :  { %1950 = vrot.lane.b32.xlu1 %v2855_v34, %s2943_s10 }
0x14da   :  { %v2857_v16 = vpop.eup %2856 }
0x14db   :  { %v1944_v45 = vadd.f32 1.0, %v2857_v16 }
0x14dd   :  { %2858 = vrcp.f32 %v1944_v45 }
0x14e7   :  { %v2859_v23 = vpop.eup %2858 }
0x14e8   :  { %v1948_v51 = vmul.f32 %v2859_v23, %v1825_v12 }
0x154b   :  { %v1951_v10 = vpop.permute.xlu1 %1950 }
0x154c   :  { %v1953_v50 = vmul.f32 %v2859_v23, %v1951_v10 }
0x154e   :  { %1955 = vrot.lane.b32.xlu0 %v1953_v50, %s2944_s13 }
0x15c0   :  { %v1956_v52 = vpop.permute.xlu0 %1955 }
0x15c1   :  { %v1958_v55 = vadd.f32 %v1956_v52, %v1948_v51 }
0x15c3   :  { %2860 = vtanh.f32 %v1958_v55 }
0x15cd   :  { %v2861_v56 = vpop.eup %2860 }
0x15ce   :  { %1961 = vrot.lane.b32.xlu1 %v2861_v56, %s2943_s10 }
0x1640   :  { %v1962_v14 = vpop.permute.xlu1 %1961 }
0x1641   :  { %v1964_v61 = vmul.f32 %v2859_v23, %v1962_v14 }
0x1643   :  { %v1965_v62 = vpack.c.bf16 %v1964_v61, %v1964_v61 }
0x1645   :  { %1967 = vrot.lane.b32.xlu0 %v1965_v62, %s2944_s13 }
0x16b7   :  { %v1968_v63 = vpop.permute.xlu0 %1967 }
0x16b8   :  { %2518 = vmatmul.mubr.msk.bf16.vlgmr.msra.gmra.mrb[20].mxu0 %vm1189_vm8, %v1968_v63 }
0x16b9   :  { %2106 = vmatpush1.bf16.msra.mxu0 %v3209_v53  ;;  %2137 = vmatprep.mubr.bf16.mxu0 %v2940_v59 }
0x16ba   :  { %2107 = vmatprep.subr.bf16.mxu0 %v3211_v54 }
0x16bd   :  { %2108 = vmatpush1.bf16.msra.mxu0 %v3222_v58 }
0x16be   :  { %2238 = vmatprep.subr.bf16.mxu0 %v3190_v46 }
0x178b   :  { %v2006_v60 = vpop.f32.mrb[20].mxu0 }
0x178c   :  { %v2008_v2 = vpop.f32.mrb[21].mxu0 }
0x178d   :  { %v2017_v4 = vadd.f32 %v3128_v20, %v2008_v2  ;;  %v2010_v26 = vpop.f32.mrb[22].mxu0 }
0x178e   :  { %v2011_v5 = vpop.f32.mrb[23].mxu0 }
0x178f   :  { %v2519_v6 = vmul.f32 -1.442695, %v2017_v4 }
0x1791   :  { %2862 = vpow2.f32 %v2519_v6 }
0x179b   :  { %v2863_v9 = vpop.eup %2862 }
0x179c   :  { %v2021_v8 = vadd.f32 1.0, %v2863_v9 }
0x179e   :  { %2864 = vrcp.f32 %v2021_v8 }
0x17a8   :  { %v2865_v7 = vpop.eup %2864 }
0x17a9   :  { %v2028_v31 = vmul.f32 %v2865_v7, %v3336_v44 }
0x17ab   :  { %v2029_v36 = vpack.c.bf16 %v2028_v31, %v2028_v31 }
0x17ad   :  { %2687 = vmatmul.mubr.msk.bf16.vlgmr.msra.gmra.mrb[28].mxu1 %vm1189_vm8, %v2029_v36 }
0x17ae   :  { %2691 = vmatpush3.bf16.msra.mxu1 %v3293_v47  ;;  %2694 = vmatprep.mubr.msk.bf16.mxu1 %vm2942_vm7, %v2941_v48 }
0x17af   :  { %2692 = vmatprep.subr.bf16.mxu1 %v2941_v48 }
0x17b2   :  { %2693 = vmatpush3.bf16.msra.mxu1 %v3305_v49 }
0x17b3   :  { %2698 = vmatprep.subr.bf16.mxu1 %v2941_v48 }
0x1880   :  { %v2067_v20 = vpop.f32.mrb[28].mxu1 }
0x1881   :  { %v2068_v46 = vadd.f32 %v2067_v20, %v2006_v60  ;;  %v2688_v12 = vpop.f32.mrb[29].mxu1 }
0x1882   :  { %v2070_v13 = vpop.f32.mrb[30].mxu1 }
0x1883   :  { %v2073_v44 = vadd.f32 %v3354_v29, %v2068_v46  ;;  %v2689_v22 = vpop.f32.mrb[31].mxu1 }
0x1885   :  { %2866 = vtanh.f32 %v2073_v44  ;;  %v2521_v57 = vmul.f32 -1.442695, %v2073_v44 }
0x1887   :  { %2868 = vpow2.f32 %v2521_v57 }
0x188f   :  { %v2867_v18 = vpop.eup %2866 }
0x1890   :  { %2083 = vrot.lane.b32.xlu1 %v2867_v18, %s2943_s10 }
0x1891   :  { %v2869_v0 = vpop.eup %2868 }
0x1892   :  { %v2077_v19 = vadd.f32 1.0, %v2869_v0 }
0x1894   :  { %2870 = vrcp.f32 %v2077_v19 }
0x189e   :  { %v2871_v24 = vpop.eup %2870 }
0x189f   :  { %v2081_v33 = vmul.f32 %v2871_v24, %v1958_v55 }
0x1902   :  { %v2084_v25 = vpop.permute.xlu1 %2083 }
0x1903   :  { %v2086_v32 = vmul.f32 %v2871_v24, %v2084_v25 }
0x1905   :  { %2088 = vrot.lane.b32.xlu0 %v2086_v32, %s2944_s13 }
0x1977   :  { %v2089_v35 = vpop.permute.xlu0 %2088 }
0x1978   :  { %v2091_v37 = vadd.f32 %v2089_v35, %v2081_v33 }
0x197a   :  { %2872 = vtanh.f32 %v2091_v37 }
0x1984   :  { %v2873_v11 = vpop.eup %2872 }
0x1985   :  { %2094 = vrot.lane.b32.xlu1 %v2873_v11, %s2943_s10 }
0x19f7   :  { %v2095_v38 = vpop.permute.xlu1 %2094 }
0x19f8   :  { %v2097_v27 = vmul.f32 %v2871_v24, %v2095_v38  ;;  %v2365_v38 = vld [vmem:[%s3533_s14 + $0x8] sm:$0xff] }
0x19fa   :  { %v2098_v41 = vpack.c.bf16 %v2097_v27, %v2097_v27  ;;  %v2366_v27 = vld [vmem:[%s3533_s14 + $0x10] sm:$0xff] }
0x19fc   :  { %2100 = vrot.lane.b32.xlu0 %v2098_v41, %s2944_s13  ;;  %v2945_v41 = vmov 0.0|0.0  }
0x1a6e   :  { %v2101_v15 = vpop.permute.xlu0 %2100 }
0x1a6f   :  { %2522 = vmatmul.mubr.msk.bf16.vlgmr.msra.gmra.mrb[24].mxu0 %vm1189_vm8, %v2101_v15 }
0x1a70   :  { %2239 = vmatpush1.bf16.msra.mxu0 %v3209_v53  ;;  %2270 = vmatprep.mubr.bf16.mxu0 %v2940_v59 }
0x1a71   :  { %2240 = vmatprep.subr.bf16.mxu0 %v3211_v54 }
0x1a74   :  { %2241 = vmatpush1.bf16.msra.mxu0 %v3222_v58 }
0x1a75   :  { %2729 = vmatprep.subr.bf16.mxu0 %v2945_v41 }
0x1b42   :  { %v2139_v42 = vpop.f32.mrb[24].mxu0 }
0x1b43   :  { %v2141_v43 = vpop.f32.mrb[25].mxu0 }
0x1b44   :  { %v2150_v39 = vadd.f32 %v3131_v1, %v2141_v43  ;;  %v2143_v40 = vpop.f32.mrb[26].mxu0 }
0x1b45   :  { %v2144_v30 = vpop.f32.mrb[27].mxu0 }
0x1b46   :  { %v2523_v34 = vmul.f32 -1.442695, %v2150_v39 }
0x1b48   :  { %2874 = vpow2.f32 %v2523_v34 }
0x1b52   :  { %v2875_v28 = vpop.eup %2874 }
0x1b53   :  { %v2154_v16 = vadd.f32 1.0, %v2875_v28  ;;  %v2530_v28 = vld [vmem:[%s3534_s15] ss:$0 sm:$0xff] }
0x1b55   :  { %2876 = vrcp.f32 %v2154_v16 }
0x1b5f   :  { %v2877_v45 = vpop.eup %2876 }
0x1b60   :  { %v2161_v53 = vmul.f32 %v2877_v45, %v3339_v17 }
0x1b62   :  { %v2162_v23 = vpack.c.bf16 %v2161_v53, %v2161_v53 }
0x1b64   :  { %2695 = vmatmul.mubr.msk.bf16.vlgmr.msra.gmra.mrb[32].mxu1 %vm1189_vm8, %v2162_v23 }
0x1b65   :  { %2699 = vmatpush3.bf16.msra.mxu1 %v3293_v47  ;;  %2702 = vmatprep.mubr.msk.bf16.mxu1 %vm2942_vm7, %v2941_v48 }
0x1b66   :  { %2700 = vmatprep.subr.bf16.mxu1 %v2941_v48 }
0x1b69   :  { %2701 = vmatpush3.bf16.msra.mxu1 %v3305_v49 }
0x1c37   :  { %v2200_v1 = vpop.f32.mrb[32].mxu1 }
0x1c38   :  { %v2201_v54 = vadd.f32 %v2200_v1, %v2139_v42  ;;  %v2696_v58 = vpop.f32.mrb[33].mxu1  ;;  %v2367_v42 = vld [vmem:[%s3533_s14 + $0x18] sm:$0xff] }
0x1c39   :  { %v2203_v59 = vpop.f32.mrb[34].mxu1  ;;  %v2733_v43 = vpack.c.bf16 %v2367_v42, %v2366_v27 }
0x1c3a   :  { %v2206_v10 = vadd.f32 %v3354_v29, %v2201_v54  ;;  %v2697_v50 = vpop.f32.mrb[35].mxu1 }
0x1c3c   :  { %2878 = vtanh.f32 %v2206_v10  ;;  %v2525_v51 = vmul.f32 -1.442695, %v2206_v10 }
0x1c3e   :  { %2880 = vpow2.f32 %v2525_v51 }
0x1c46   :  { %v2879_v17 = vpop.eup %2878 }
0x1c47   :  { %2216 = vrot.lane.b32.xlu1 %v2879_v17, %s2943_s10 }
0x1c48   :  { %v2881_v47 = vpop.eup %2880 }
0x1c49   :  { %v2210_v52 = vadd.f32 1.0, %v2881_v47 }
0x1c4b   :  { %2882 = vrcp.f32 %v2210_v52 }
0x1c55   :  { %v2883_v55 = vpop.eup %2882 }
0x1c56   :  { %v2214_v49 = vmul.f32 %v2883_v55, %v2091_v37 }
0x1cb9   :  { %v2217_v56 = vpop.permute.xlu1 %2216 }
0x1cba   :  { %v2219_v14 = vmul.f32 %v2883_v55, %v2217_v56 }
0x1cbc   :  { %2221 = vrot.lane.b32.xlu0 %v2219_v14, %s2944_s13 }
0x1d2e   :  { %v2222_v61 = vpop.permute.xlu0 %2221 }
0x1d2f   :  { %v2224_v62 = vadd.f32 %v2222_v61, %v2214_v49 }
0x1d31   :  { %2884 = vtanh.f32 %v2224_v62 }
0x1d3b   :  { %v2885_v63 = vpop.eup %2884 }
0x1d3c   :  { %2227 = vrot.lane.b32.xlu1 %v2885_v63, %s2943_s10 }
0x1dae   :  { %v2228_v60 = vpop.permute.xlu1 %2227 }
0x1daf   :  { %v2230_v2 = vmul.f32 %v2883_v55, %v2228_v60 }
0x1db1   :  { %v2231_v4 = vpack.c.bf16 %v2230_v2, %v2230_v2 }
0x1db3   :  { %2233 = vrot.lane.b32.xlu0 %v2231_v4, %s2944_s13 }
0x1e25   :  { %v2234_v26 = vpop.permute.xlu0 %2233 }
0x1e26   :  { %2526 = vmatmul.mubr.msk.bf16.vlgmr.msra.gmra.mrb[28].mxu0 %vm1189_vm8, %v2234_v26 }
0x1e27   :  { %2714 = vmatprep.mubr.msk.f32.mxu0 %vm2942_vm7, %v2941_v48 }
0x1ef9   :  { %v2272_v5 = vpop.f32.mrb[28].mxu0 }
0x1efa   :  { %v2274_v6 = vpop.f32.mrb[29].mxu0 }
0x1efb   :  { %v2283_v9 = vadd.f32 %v3134_v21, %v2274_v6  ;;  %v2276_v8 = vpop.f32.mrb[30].mxu0 }
0x1efc   :  { %v2277_v7 = vpop.f32.mrb[31].mxu0 }
0x1efd   :  { %v2527_v31 = vmul.f32 -1.442695, %v2283_v9 }
0x1eff   :  { %2886 = vpow2.f32 %v2527_v31 }
0x1f09   :  { %v2887_v36 = vpop.eup %2886 }
0x1f0a   :  { %v2287_v20 = vadd.f32 1.0, %v2887_v36 }
0x1f0c   :  { %2888 = vrcp.f32 %v2287_v20 }
0x1f16   :  { %v2889_v46 = vpop.eup %2888 }
0x1f17   :  { %v2294_v12 = vmul.f32 %v2889_v46, %v3343_v3 }
0x1f19   :  { %v2295_v13 = vpack.c.bf16 %v2294_v12, %v2294_v12 }
0x1f1b   :  { %2703 = vmatmul.mubr.msk.bf16.vlgmr.msra.gmra.mrb[36].mxu1 %vm1189_vm8, %v2295_v13 }
0x1fee   :  { %v2333_v44 = vpop.f32.mrb[36].mxu1 }
0x1fef   :  { %v2334_v22 = vadd.f32 %v2333_v44, %v2272_v5  ;;  %v2704_v48 = vpop.f32.mrb[37].mxu1 }
0x1ff0   :  { %v2336_v18 = vpop.f32.mrb[38].mxu1 }
0x1ff1   :  { %v2339_v57 = vadd.f32 %v3354_v29, %v2334_v22  ;;  %v2705_v21 = vpop.f32.mrb[39].mxu1  ;;  %v2364_v29 = vld [vmem:[%s3533_s14] sm:$0xff]  ;;  %s2458_s14 = sshll.u32 %s2946_s5, 4  ;;  %s2459_s14 = int_to_ptr.vmem [resolvable:$true] %s2458_s14 }
0x1ff2   :  { %v2730_v15 = vpack.c.bf16 %v2365_v38, %v2364_v29  ;;  %s2910_s28 = scalar_lea.vmem %s2459_s14, 32  ;;  %p2915_p6 = scmp.lt.s32.totalorder %s2459_s14, %s2459_s14 }
0x1ff3   :  { %2890 = vtanh.f32 %v2339_v57  ;;  %v2529_v19 = vmul.f32 -1.442695, %v2339_v57  ;;  %p2911_p5 = scmp.ne.s32.totalorder %s2459_s14, %s2910_s28  ;;  %p2916_p7 = scmp.lt.s32.totalorder %s2910_s28, %s2910_s28 }
0x1ff4   :  { %2731 = vmatpush3.bf16.msra.mxu0 %v2730_v15 }
0x1ff5   :  { %2892 = vpow2.f32 %v2529_v19  ;;  %2732 = vmatprep.subr.bf16.mxu0 %v2945_v41  ;;  %p2917_p8 = por %p2916_p7, %p2915_p6 }
0x1ff7   :  { %p2918_p9 = pnand %p2917_p8, %p2911_p5 }
0x1ff8   :  { %2734 = vmatpush3.bf16.msra.mxu0 %v2733_v43 }
0x1ffd   :  { %v2891_v0 = vpop.eup %2890 }
0x1ffe   :  { %2349 = vrot.lane.b32.xlu1 %v2891_v0, %s2943_s10 }
0x1fff   :  { %v2893_v24 = vpop.eup %2892 }
0x2000   :  { %v2343_v25 = vadd.f32 1.0, %v2893_v24 }
0x2002   :  { %2894 = vrcp.f32 %v2343_v25 }
0x200c   :  { %v2895_v3 = vpop.eup %2894 }
0x200d   :  { %v2347_v35 = vmul.f32 %v2895_v3, %v2224_v62 }
0x2070   :  { %v2350_v32 = vpop.permute.xlu1 %2349 }
0x2071   :  { %v2352_v33 = vmul.f32 %v2895_v3, %v2350_v32 }
0x2073   :  { %2354 = vrot.lane.b32.xlu0 %v2352_v33, %s2944_s13 }
0x20e5   :  { %v2355_v37 = vpop.permute.xlu0 %2354 }
0x20e6   :  { %v2357_v11 = vadd.f32 %v2355_v37, %v2347_v35 }
0x20e8   :  { %2896 = vtanh.f32 %v2357_v11 }
0x20f2   :  { %v2897_v39 = vpop.eup %2896 }
0x20f3   :  { %2360 = vrot.lane.b32.xlu1 %v2897_v39, %s2943_s10 }
0x2165   :  { %v2361_v40 = vpop.permute.xlu1 %2360 }
0x2166   :  { %v2363_v30 = vmul.f32 %v2895_v3, %v2361_v40 }
0x2168   :  { %2376 = vrot.lane.b32.xlu0 %v2363_v30, %s2944_s13 }
0x21da   :  { %v2377_v34 = vpop.permute.xlu0 %2376 }
0x21db   :  { %2715 = vmatmul.mubr.msk.f32.vlgmr.msra.gmra.mrb[32].mxu0 %vm1189_vm8, %v2377_v34 }
0x22ae   :  { %v2446_v16 = vpop.f32.mrb[32].mxu0 }
0x22af   :  { %v2447_v45 = vadd.f32 %v2530_v28, %v2446_v16  ;;  %v2716_v53 = vpop.f32.mrb[33].mxu0 }
0x22b1   :  { %2451 = vst.msk [vmem:[#allocation5] sm:$0x3] %vm2450_vm9, %v2447_v45 }
0x22b2   :  { %2921 = shalt.err (!%p2918_p9)
}
0x22b3   :  { %s2922_s6 = scalar_lea.hbm %s3535_s16, 32 }
0x22b4   :  { %p2923_p10 = scmp.ne.s32.totalorder %s3535_s16, %s2922_s6  ;;  %p2926_p11 = scmp.lt.u32.totalorder %s2922_s6, %s3535_s16 }
0x22b6   :  { %p2928_p12 = pnand %p2926_p11, %p2923_p10 }
0x22b8   :  { %2931 = shalt.err (!%p2928_p12)
}
0x22b9   :  { %2461 = dma.vmem_to_hbm [thread:$0]  %s2459_s14, 32, %s3535_s16, [#allocation3]  }
0x22ba   :  { %2934 = dma.done.wait [#allocation3], 32  }
0x22bb   :  { %2935 = vsyncadd [#allocation3], 4294967264 }
0x22bc   :  { %2465 = vsyncpa [#allocation3], 1 }
0x22bd   :  { %2466 = vsyncpa [#allocation4], 1 }

</bundles_post_ra>
